<compile_context>
chip_gen: v7x
topology: tpu7x:2x2x1
jax: 0.10.0
libtpu: 0.0.40
codegen_flags: <defaults>
</compile_context>

<pallas_src>
import functools

import jax
import jax.numpy as jnp
from jax.experimental import pallas as pl
from jax.experimental.pallas import tpu as pltpu


# ----------------------------- helpers --------------------------------------

def _pick_batch_tile(B, max_tile, unit):
    """Largest batch tile that divides B, is <= max_tile and a multiple of
    `unit` (falls back to a single full block)."""
    if B <= max_tile:
        return B
    t = max_tile - (max_tile % unit)
    while t >= unit:
        if B % t == 0:
            return t
        t -= unit
    return B


def _pack_conv_toeplitz(w, W_in):
    """Pack a (O, C, k, k) conv weight into k Toeplitz matrices that compute the
    conv along the minor (x) axis, split into even / odd output columns.

    Returns (w_even, w_odd), each of shape (k, C*W_in, O*Wp) with
      w_even[i, c*W_in + xin, o*Wp + xp] = w[o, c, i, xin - 2*xp]   (if valid)
      w_odd [i, c*W_in + xin, o*Wp + xp] = w[o, c, i, xin - (2*xp+1)]
    """
    O, C, k, _ = w.shape
    Wo = W_in - k + 1
    Wp = Wo // 2
    xin = jnp.arange(W_in)[:, None]          # (W_in, 1)
    xout = jnp.arange(Wo)[None, :]           # (1, Wo)
    j = xin - xout                           # kernel tap index
    valid = (j >= 0) & (j < k)
    jc = jnp.clip(j, 0, k - 1)
    t = w[:, :, :, jc]                       # (O, C, k, W_in, Wo)
    t = jnp.where(valid[None, None, None], t, 0.0)
    t = t.transpose(2, 1, 3, 0, 4).reshape(k, C * W_in, O, Wo)
    w_even = t[..., 0::2].reshape(k, C * W_in, O * Wp)
    w_odd = t[..., 1::2].reshape(k, C * W_in, O * Wp)
    return w_even.astype(jnp.float32), w_odd.astype(jnp.float32)


def _row_select_matrix(TB, H, Hp, R):
    """(TB*Hp, R-1) 0/1 matrix selecting row (b*H + 2*yp) -> output row (b*Hp + yp)."""
    p = jnp.arange(TB * Hp)
    tgt = (p // Hp) * H + 2 * (p % Hp)
    r = jnp.arange(R - 1)
    return (r[None, :] == tgt[:, None]).astype(jnp.float32)


# ----------------------------- Pallas kernels -------------------------------

def _conv_pool_relu_kernel(x_ref, we_ref, wo_ref, b_ref, sel_ref, o_ref, *, k):
    """Fused conv(k x k, valid) + bias + 2x2 maxpool(stride 2) + ReLU.

    x_ref  : (TB*H, C*W)        activation, rows = (b, y), cols = (c, x)
    we_ref : (k, C*W, O*Wp)     Toeplitz weights producing even output columns
    wo_ref : (k, C*W, O*Wp)     Toeplitz weights producing odd  output columns
    b_ref  : (1, O*Wp)          bias broadcast row
    sel_ref: (TB*Hp, R-1)       0/1 row-selection matrix (vertical stride-2 pick)
    o_ref  : (TB*Hp, O*Wp)      pooled+ReLU output, rows=(b,yp), cols=(o,xp)
    """
    rows = x_ref.shape[0]
    n_out = we_ref.shape[2]
    R = rows - (k - 1)

    x = x_ref[...]
    acc_e = jnp.zeros((R, n_out), jnp.float32)
    acc_o = jnp.zeros((R, n_out), jnp.float32)
    for i in range(k):                       # static unroll, k == 5
        xs = x[i:i + R, :]                   # row-shifted slab (sublane shift)
        acc_e = acc_e + jnp.dot(xs, we_ref[i], preferred_element_type=jnp.float32)
        acc_o = acc_o + jnp.dot(xs, wo_ref[i], preferred_element_type=jnp.float32)

    # 2x2 max pool: horizontal pair (even col vs odd col), then vertical pair
    # (adjacent rows), then stride-2 row selection via a tiny 0/1 matmul.
    hmax = jnp.maximum(acc_e, acc_o)                     # (R, O*Wp)
    vmax = jnp.maximum(hmax[0:R - 1, :], hmax[1:R, :])   # (R-1, O*Wp)
    pooled = jnp.dot(sel_ref[...], vmax, preferred_element_type=jnp.float32)
    # bias is constant over each pooling window -> add after max; then ReLU.
    o_ref[...] = jnp.maximum(pooled + b_ref[...], 0.0)


def _fc_kernel(x_ref, w1_ref, b1_ref, w2_ref, b2_ref, o_ref):
    """Fused fc1 + ReLU + fc2 (eval mode). Output padded to 128 lanes."""
    h = jnp.dot(x_ref[...], w1_ref[...], preferred_element_type=jnp.float32)
    h = jnp.maximum(h + b1_ref[...], 0.0)
    # TODO(synk): F.dropout / nn.Dropout2d are identity here (eval-mode forward);
    # train-mode stochastic masking not implemented.
    o_ref[...] = (jnp.dot(h, w2_ref[...], preferred_element_type=jnp.float32)
                  + b2_ref[...])


# ----------------------------- stage wrappers --------------------------------

def _conv_stage(x_rows, w_even, w_odd, bias_row, *, B, C, H, W, O, k):
    Ho, Wo = H - k + 1, W - k + 1
    Hp, Wp = Ho // 2, Wo // 2
    TB = _pick_batch_tile(B, 16, 2)          # bounded per-step VMEM working set
    R = TB * H - (k - 1)
    sel = _row_select_matrix(TB, H, Hp, R)   # data-independent -> const-folded

    kernel = functools.partial(_conv_pool_relu_kernel, k=k)
    return pl.pallas_call(
        kernel,
        out_shape=jax.ShapeDtypeStruct((B * Hp, O * Wp), jnp.float32),
        grid=(B // TB,),
        in_specs=[
            pl.BlockSpec((TB * H, C * W), lambda g: (g, 0)),
            pl.BlockSpec((k, C * W, O * Wp), lambda g: (0, 0, 0)),
            pl.BlockSpec((k, C * W, O * Wp), lambda g: (0, 0, 0)),
            pl.BlockSpec((1, O * Wp), lambda g: (0, 0)),
            pl.BlockSpec((TB * Hp, R - 1), lambda g: (0, 0)),
        ],
        out_specs=pl.BlockSpec((TB * Hp, O * Wp), lambda g: (g, 0)),
        compiler_params=pltpu.CompilerParams(dimension_semantics=("parallel",)),
    )(x_rows, w_even, w_odd, bias_row, sel)


def _fc_stage(flat, w1, b1, w2, b2):
    B, K = flat.shape
    N1 = w1.shape[1]
    N2 = w2.shape[1]
    TB = _pick_batch_tile(B, 256, 8)
    return pl.pallas_call(
        _fc_kernel,
        out_shape=jax.ShapeDtypeStruct((B, N2), jnp.float32),
        grid=(B // TB,),
        in_specs=[
            pl.BlockSpec((TB, K), lambda g: (g, 0)),
            pl.BlockSpec((K, N1), lambda g: (0, 0)),
            pl.BlockSpec((1, N1), lambda g: (0, 0)),
            pl.BlockSpec((N1, N2), lambda g: (0, 0)),
            pl.BlockSpec((1, N2), lambda g: (0, 0)),
        ],
        out_specs=pl.BlockSpec((TB, N2), lambda g: (g, 0)),
        compiler_params=pltpu.CompilerParams(dimension_semantics=("parallel",)),
    )(flat, w1, b1, w2, b2)


# ------------------------------ model ----------------------------------------

def init_params(key, n_classes):
    ks = jax.random.split(key, 8)

    def u(k, shape, fan_in):
        bound = 1.0 / jnp.sqrt(float(fan_in))
        return jax.random.uniform(k, shape, jnp.float32, -bound, bound)

    return {
        "conv1_w": u(ks[0], (10, 1, 5, 5), 1 * 5 * 5),
        "conv1_b": u(ks[1], (10,), 1 * 5 * 5),
        "conv2_w": u(ks[2], (20, 10, 5, 5), 10 * 5 * 5),
        "conv2_b": u(ks[3], (20,), 10 * 5 * 5),
        "fc1_w":   u(ks[4], (50, 320), 320),
        "fc1_b":   u(ks[5], (50,), 320),
        "fc2_w":   u(ks[6], (n_classes, 50), 50),
        "fc2_b":   u(ks[7], (n_classes,), 50),
    }


def pack_params(params, n_classes):
    """One-time weight packing (Toeplitz conv matrices, permuted/padded FC)."""
    assert n_classes <= 128
    p = {}
    p["c1_we"], p["c1_wo"] = _pack_conv_toeplitz(params["conv1_w"], W_in=28)
    p["c1_b"] = jnp.repeat(params["conv1_b"], 12)[None, :]          # (1, 10*12)
    p["c2_we"], p["c2_wo"] = _pack_conv_toeplitz(params["conv2_w"], W_in=12)
    p["c2_b"] = jnp.repeat(params["conv2_b"], 4)[None, :]           # (1, 20*4)

    # Conv-stage-2 output flattens (free reshape) to columns ordered (y, o, x);
    # permute fc1's K axis once to match, then zero-pad hidden 50 -> 64 and the
    # logits 10 -> 128 so all FC matmuls / stores are lane/sublane friendly.
    w1p = params["fc1_w"].reshape(50, 20, 4, 4).transpose(2, 1, 3, 0).reshape(320, 50)
    p["fc1_w"] = jnp.pad(w1p, ((0, 0), (0, 64 - 50)))                # (320, 64)
    p["fc1_b"] = jnp.pad(params["fc1_b"], (0, 64 - 50))[None, :]     # (1, 64)
    w2p = params["fc2_w"].T                                          # (50, n_classes)
    p["fc2_w"] = jnp.pad(w2p, ((0, 64 - 50), (0, 128 - n_classes)))  # (64, 128)
    p["fc2_b"] = jnp.pad(params["fc2_b"], (0, 128 - n_classes))[None, :]
    return p


def net_forward(packed, x, *, n_classes):
    # x: (B, 1, 28, 28) float32 (fc1 in_features=320 fixes the 28x28 input)
    B = x.shape[0]
    x_rows = x.reshape(B * 28, 28)                       # [(b,y), x]  (free)
    a1 = _conv_stage(x_rows, packed["c1_we"], packed["c1_wo"], packed["c1_b"],
                     B=B, C=1, H=28, W=28, O=10, k=5)    # (B*12, 120)
    a2 = _conv_stage(a1, packed["c2_we"], packed["c2_wo"], packed["c2_b"],
                     B=B, C=10, H=12, W=12, O=20, k=5)   # (B*4, 80)
    flat = a2.reshape(B, 320)                            # free reshape, (y,o,x) order
    logits = _fc_stage(flat, packed["fc1_w"], packed["fc1_b"],
                       packed["fc2_w"], packed["fc2_b"])  # (B, 128) padded
    return logits[:, :n_classes]


# ------------------------------ reference ------------------------------------

def reference_forward(params, x):
    def conv(x, w, b):
        y = jax.lax.conv_general_dilated(
            x, w, (1, 1), "VALID", dimension_numbers=("NCHW", "OIHW", "NCHW"))
        return y + b[None, :, None, None]

    def pool(x):
        return jax.lax.reduce_window(x, -jnp.inf, jax.lax.max,
                                     (1, 1, 2, 2), (1, 1, 2, 2), "VALID")

    x = jax.nn.relu(pool(conv(x, params["conv1_w"], params["conv1_b"])))
    x = jax.nn.relu(pool(conv(x, params["conv2_w"], params["conv2_b"])))
    x = x.reshape(x.shape[0], -1)
    x = jax.nn.relu(x @ params["fc1_w"].T + params["fc1_b"])
    return x @ params["fc2_w"].T + params["fc2_b"]


if __name__ == "__main__":
    n_classes = 10
    key = jax.random.PRNGKey(0)
    k_params, k_x = jax.random.split(key)
    params = init_params(k_params, n_classes)
    x = jax.random.normal(k_x, (2, 1, 28, 28), jnp.float32)

    packed = pack_params(params, n_classes)
    fwd = jax.jit(functools.partial(net_forward, n_classes=n_classes))
    out = fwd(packed, x)
    jax.block_until_ready(out)

    assert out.shape == (2, n_classes)
    assert out.dtype == jnp.float32
    assert bool(jnp.all(jnp.isfinite(out)))

    ref = reference_forward(params, x)
    assert bool(jnp.allclose(out, ref, rtol=5e-2, atol=5e-2)), (
        "max abs err = %f" % float(jnp.max(jnp.abs(out - ref))))
    print("KERNEL_OK")
</pallas_src>

<mosaic_0001>
module attributes {stable_mosaic.version = 11 : i64} {
  func.func @_conv_pool_relu_kernel(%arg0: i32, %arg1: memref<56x28xf32, #tpu.memory_space<vmem>>, %arg2: memref<5x28x120xf32, #tpu.memory_space<vmem>>, %arg3: memref<5x28x120xf32, #tpu.memory_space<vmem>>, %arg4: memref<1x120xf32, #tpu.memory_space<vmem>>, %arg5: memref<24x51xf32, #tpu.memory_space<vmem>>, %arg6: memref<24x120xf32, #tpu.memory_space<vmem>>) attributes {dimension_semantics = [#tpu.dimension_semantics<parallel>], iteration_bounds = array<i64: 1>, scalar_prefetch = 0 : i64, scratch_operands = 0 : i64, tpu.core_type = #tpu.core_type<tc>, window_params = [{transform_indices = @transform_0, window_bounds = array<i64: 56, 28>}, {pipeline_mode = #tpu.pipeline_mode<synchronous>, transform_indices = @transform_1, window_bounds = array<i64: 5, 28, 120>}, {pipeline_mode = #tpu.pipeline_mode<synchronous>, transform_indices = @transform_2, window_bounds = array<i64: 5, 28, 120>}, {pipeline_mode = #tpu.pipeline_mode<synchronous>, transform_indices = @transform_3, window_bounds = array<i64: 1, 120>}, {pipeline_mode = #tpu.pipeline_mode<synchronous>, transform_indices = @transform_4, window_bounds = array<i64: 24, 51>}, {transform_indices = @transform_5, window_bounds = array<i64: 24, 120>}]} {
    %c0 = arith.constant 0 : index
    %c0_0 = arith.constant 0 : index
    %0 = vector.load %arg1[%c0, %c0_0] : memref<56x28xf32, #tpu.memory_space<vmem>>, vector<56x28xf32>
    %cst = arith.constant 0.000000e+00 : f32
    %1 = vector.broadcast %cst : f32 to vector<52x120xf32>
    %cst_1 = arith.constant 0.000000e+00 : f32
    %2 = vector.broadcast %cst_1 : f32 to vector<52x120xf32>
    %3 = vector.extract_strided_slice %0 {offsets = [0, 0], sizes = [52, 28], strides = [1, 1]} : vector<56x28xf32> to vector<52x28xf32>
    %c0_2 = arith.constant 0 : index
    %c0_3 = arith.constant 0 : index
    %c0_4 = arith.constant 0 : index
    %4 = vector.load %arg2[%c0_2, %c0_3, %c0_4] : memref<5x28x120xf32, #tpu.memory_space<vmem>>, vector<1x28x120xf32>
    %5 = vector.shape_cast %4 : vector<1x28x120xf32> to vector<28x120xf32>
    %cst_5 = arith.constant dense<0.000000e+00> : vector<52x120xf32>
    %6 = tpu.matmul %3, %5, %cst_5 {dimension_numbers = #tpu.dot_dimension_numbers<[1], [0], [0], [1], [0, 0, 1, 1], [], []>} : vector<52x28xf32>, vector<28x120xf32>, vector<52x120xf32> -> vector<52x120xf32>
    %7 = arith.addf %1, %6 : vector<52x120xf32>
    %c0_6 = arith.constant 0 : index
    %c0_7 = arith.constant 0 : index
    %c0_8 = arith.constant 0 : index
    %8 = vector.load %arg3[%c0_6, %c0_7, %c0_8] : memref<5x28x120xf32, #tpu.memory_space<vmem>>, vector<1x28x120xf32>
    %9 = vector.shape_cast %8 : vector<1x28x120xf32> to vector<28x120xf32>
    %cst_9 = arith.constant dense<0.000000e+00> : vector<52x120xf32>
    %10 = tpu.matmul %3, %9, %cst_9 {dimension_numbers = #tpu.dot_dimension_numbers<[1], [0], [0], [1], [0, 0, 1, 1], [], []>} : vector<52x28xf32>, vector<28x120xf32>, vector<52x120xf32> -> vector<52x120xf32>
    %11 = arith.addf %2, %10 : vector<52x120xf32>
    %12 = vector.extract_strided_slice %0 {offsets = [1, 0], sizes = [52, 28], strides = [1, 1]} : vector<56x28xf32> to vector<52x28xf32>
    %c1 = arith.constant 1 : index
    %c0_10 = arith.constant 0 : index
    %c0_11 = arith.constant 0 : index
    %13 = vector.load %arg2[%c1, %c0_10, %c0_11] : memref<5x28x120xf32, #tpu.memory_space<vmem>>, vector<1x28x120xf32>
    %14 = vector.shape_cast %13 : vector<1x28x120xf32> to vector<28x120xf32>
    %cst_12 = arith.constant dense<0.000000e+00> : vector<52x120xf32>
    %15 = tpu.matmul %12, %14, %cst_12 {dimension_numbers = #tpu.dot_dimension_numbers<[1], [0], [0], [1], [0, 0, 1, 1], [], []>} : vector<52x28xf32>, vector<28x120xf32>, vector<52x120xf32> -> vector<52x120xf32>
    %16 = arith.addf %7, %15 : vector<52x120xf32>
    %c1_13 = arith.constant 1 : index
    %c0_14 = arith.constant 0 : index
    %c0_15 = arith.constant 0 : index
    %17 = vector.load %arg3[%c1_13, %c0_14, %c0_15] : memref<5x28x120xf32, #tpu.memory_space<vmem>>, vector<1x28x120xf32>
    %18 = vector.shape_cast %17 : vector<1x28x120xf32> to vector<28x120xf32>
    %cst_16 = arith.constant dense<0.000000e+00> : vector<52x120xf32>
    %19 = tpu.matmul %12, %18, %cst_16 {dimension_numbers = #tpu.dot_dimension_numbers<[1], [0], [0], [1], [0, 0, 1, 1], [], []>} : vector<52x28xf32>, vector<28x120xf32>, vector<52x120xf32> -> vector<52x120xf32>
    %20 = arith.addf %11, %19 : vector<52x120xf32>
    %21 = vector.extract_strided_slice %0 {offsets = [2, 0], sizes = [52, 28], strides = [1, 1]} : vector<56x28xf32> to vector<52x28xf32>
    %c2 = arith.constant 2 : index
    %c0_17 = arith.constant 0 : index
    %c0_18 = arith.constant 0 : index
    %22 = vector.load %arg2[%c2, %c0_17, %c0_18] : memref<5x28x120xf32, #tpu.memory_space<vmem>>, vector<1x28x120xf32>
    %23 = vector.shape_cast %22 : vector<1x28x120xf32> to vector<28x120xf32>
    %cst_19 = arith.constant dense<0.000000e+00> : vector<52x120xf32>
    %24 = tpu.matmul %21, %23, %cst_19 {dimension_numbers = #tpu.dot_dimension_numbers<[1], [0], [0], [1], [0, 0, 1, 1], [], []>} : vector<52x28xf32>, vector<28x120xf32>, vector<52x120xf32> -> vector<52x120xf32>
    %25 = arith.addf %16, %24 : vector<52x120xf32>
    %c2_20 = arith.constant 2 : index
    %c0_21 = arith.constant 0 : index
    %c0_22 = arith.constant 0 : index
    %26 = vector.load %arg3[%c2_20, %c0_21, %c0_22] : memref<5x28x120xf32, #tpu.memory_space<vmem>>, vector<1x28x120xf32>
    %27 = vector.shape_cast %26 : vector<1x28x120xf32> to vector<28x120xf32>
    %cst_23 = arith.constant dense<0.000000e+00> : vector<52x120xf32>
    %28 = tpu.matmul %21, %27, %cst_23 {dimension_numbers = #tpu.dot_dimension_numbers<[1], [0], [0], [1], [0, 0, 1, 1], [], []>} : vector<52x28xf32>, vector<28x120xf32>, vector<52x120xf32> -> vector<52x120xf32>
    %29 = arith.addf %20, %28 : vector<52x120xf32>
    %30 = vector.extract_strided_slice %0 {offsets = [3, 0], sizes = [52, 28], strides = [1, 1]} : vector<56x28xf32> to vector<52x28xf32>
    %c3 = arith.constant 3 : index
    %c0_24 = arith.constant 0 : index
    %c0_25 = arith.constant 0 : index
    %31 = vector.load %arg2[%c3, %c0_24, %c0_25] : memref<5x28x120xf32, #tpu.memory_space<vmem>>, vector<1x28x120xf32>
    %32 = vector.shape_cast %31 : vector<1x28x120xf32> to vector<28x120xf32>
    %cst_26 = arith.constant dense<0.000000e+00> : vector<52x120xf32>
    %33 = tpu.matmul %30, %32, %cst_26 {dimension_numbers = #tpu.dot_dimension_numbers<[1], [0], [0], [1], [0, 0, 1, 1], [], []>} : vector<52x28xf32>, vector<28x120xf32>, vector<52x120xf32> -> vector<52x120xf32>
    %34 = arith.addf %25, %33 : vector<52x120xf32>
    %c3_27 = arith.constant 3 : index
    %c0_28 = arith.constant 0 : index
    %c0_29 = arith.constant 0 : index
    %35 = vector.load %arg3[%c3_27, %c0_28, %c0_29] : memref<5x28x120xf32, #tpu.memory_space<vmem>>, vector<1x28x120xf32>
    %36 = vector.shape_cast %35 : vector<1x28x120xf32> to vector<28x120xf32>
    %cst_30 = arith.constant dense<0.000000e+00> : vector<52x120xf32>
    %37 = tpu.matmul %30, %36, %cst_30 {dimension_numbers = #tpu.dot_dimension_numbers<[1], [0], [0], [1], [0, 0, 1, 1], [], []>} : vector<52x28xf32>, vector<28x120xf32>, vector<52x120xf32> -> vector<52x120xf32>
    %38 = arith.addf %29, %37 : vector<52x120xf32>
    %39 = vector.extract_strided_slice %0 {offsets = [4, 0], sizes = [52, 28], strides = [1, 1]} : vector<56x28xf32> to vector<52x28xf32>
    %c4 = arith.constant 4 : index
    %c0_31 = arith.constant 0 : index
    %c0_32 = arith.constant 0 : index
    %40 = vector.load %arg2[%c4, %c0_31, %c0_32] : memref<5x28x120xf32, #tpu.memory_space<vmem>>, vector<1x28x120xf32>
    %41 = vector.shape_cast %40 : vector<1x28x120xf32> to vector<28x120xf32>
    %cst_33 = arith.constant dense<0.000000e+00> : vector<52x120xf32>
    %42 = tpu.matmul %39, %41, %cst_33 {dimension_numbers = #tpu.dot_dimension_numbers<[1], [0], [0], [1], [0, 0, 1, 1], [], []>} : vector<52x28xf32>, vector<28x120xf32>, vector<52x120xf32> -> vector<52x120xf32>
    %43 = arith.addf %34, %42 : vector<52x120xf32>
    %c4_34 = arith.constant 4 : index
    %c0_35 = arith.constant 0 : index
    %c0_36 = arith.constant 0 : index
    %44 = vector.load %arg3[%c4_34, %c0_35, %c0_36] : memref<5x28x120xf32, #tpu.memory_space<vmem>>, vector<1x28x120xf32>
    %45 = vector.shape_cast %44 : vector<1x28x120xf32> to vector<28x120xf32>
    %cst_37 = arith.constant dense<0.000000e+00> : vector<52x120xf32>
    %46 = tpu.matmul %39, %45, %cst_37 {dimension_numbers = #tpu.dot_dimension_numbers<[1], [0], [0], [1], [0, 0, 1, 1], [], []>} : vector<52x28xf32>, vector<28x120xf32>, vector<52x120xf32> -> vector<52x120xf32>
    %47 = arith.addf %38, %46 : vector<52x120xf32>
    %48 = arith.maximumf %43, %47 : vector<52x120xf32>
    %49 = vector.extract_strided_slice %48 {offsets = [0, 0], sizes = [51, 120], strides = [1, 1]} : vector<52x120xf32> to vector<51x120xf32>
    %50 = vector.extract_strided_slice %48 {offsets = [1, 0], sizes = [51, 120], strides = [1, 1]} : vector<52x120xf32> to vector<51x120xf32>
    %51 = arith.maximumf %49, %50 : vector<51x120xf32>
    %c0_38 = arith.constant 0 : index
    %c0_39 = arith.constant 0 : index
    %52 = vector.load %arg5[%c0_38, %c0_39] : memref<24x51xf32, #tpu.memory_space<vmem>>, vector<24x51xf32>
    %cst_40 = arith.constant dense<0.000000e+00> : vector<24x120xf32>
    %53 = tpu.matmul %52, %51, %cst_40 {dimension_numbers = #tpu.dot_dimension_numbers<[1], [0], [0], [1], [0, 0, 1, 1], [], []>} : vector<24x51xf32>, vector<51x120xf32>, vector<24x120xf32> -> vector<24x120xf32>
    %c0_41 = arith.constant 0 : index
    %c0_42 = arith.constant 0 : index
    %54 = vector.load %arg4[%c0_41, %c0_42] : memref<1x120xf32, #tpu.memory_space<vmem>>, vector<1x120xf32>
    %55 = vector.broadcast %54 : vector<1x120xf32> to vector<24x120xf32>
    %56 = arith.addf %53, %55 : vector<24x120xf32>
    %cst_43 = arith.constant 0.000000e+00 : f32
    %57 = vector.broadcast %cst_43 : f32 to vector<24x120xf32>
    %58 = arith.maximumf %56, %57 : vector<24x120xf32>
    %c0_44 = arith.constant 0 : index
    %c0_45 = arith.constant 0 : index
    %59 = vector.load %arg6[%c0_44, %c0_45] : memref<24x120xf32, #tpu.memory_space<vmem>>, vector<24x120xf32>
    tpu.vector_store %arg6[%c0_44, %c0_45], %58 {strides = array<i32>} : memref<24x120xf32, #tpu.memory_space<vmem>>, vector<24x120xf32>,
    return
  }
  func.func @transform_0(%arg0: i32) -> (i32, i32) {
    %c0_i32 = arith.constant 0 : i32
    %c0_i32_0 = arith.constant 0 : i32
    return %arg0, %c0_i32 : i32, i32
  }
  func.func @transform_1(%arg0: i32) -> (i32, i32, i32) {
    %c0_i32 = arith.constant 0 : i32
    %c0_i32_0 = arith.constant 0 : i32
    %c0_i32_1 = arith.constant 0 : i32
    %c0_i32_2 = arith.constant 0 : i32
    return %c0_i32, %c0_i32_0, %c0_i32_1 : i32, i32, i32
  }
  func.func @transform_2(%arg0: i32) -> (i32, i32, i32) {
    %c0_i32 = arith.constant 0 : i32
    %c0_i32_0 = arith.constant 0 : i32
    %c0_i32_1 = arith.constant 0 : i32
    %c0_i32_2 = arith.constant 0 : i32
    return %c0_i32, %c0_i32_0, %c0_i32_1 : i32, i32, i32
  }
  func.func @transform_3(%arg0: i32) -> (i32, i32) {
    %c0_i32 = arith.constant 0 : i32
    %c0_i32_0 = arith.constant 0 : i32
    %c0_i32_1 = arith.constant 0 : i32
    return %c0_i32, %c0_i32_0 : i32, i32
  }
  func.func @transform_4(%arg0: i32) -> (i32, i32) {
    %c0_i32 = arith.constant 0 : i32
    %c0_i32_0 = arith.constant 0 : i32
    %c0_i32_1 = arith.constant 0 : i32
    return %c0_i32, %c0_i32_0 : i32, i32
  }
  func.func @transform_5(%arg0: i32) -> (i32, i32) {
    %c0_i32 = arith.constant 0 : i32
    %c0_i32_0 = arith.constant 0 : i32
    return %arg0, %c0_i32 : i32, i32
  }
}

module attributes {stable_mosaic.version = 11 : i64} {
  func.func @_conv_pool_relu_kernel(%arg0: i32, %arg1: memref<24x120xf32, #tpu.memory_space<vmem>>, %arg2: memref<5x120x80xf32, #tpu.memory_space<vmem>>, %arg3: memref<5x120x80xf32, #tpu.memory_space<vmem>>, %arg4: memref<1x80xf32, #tpu.memory_space<vmem>>, %arg5: memref<8x19xf32, #tpu.memory_space<vmem>>, %arg6: memref<8x80xf32, #tpu.memory_space<vmem>>) attributes {dimension_semantics = [#tpu.dimension_semantics<parallel>], iteration_bounds = array<i64: 1>, scalar_prefetch = 0 : i64, scratch_operands = 0 : i64, tpu.core_type = #tpu.core_type<tc>, window_params = [{transform_indices = @transform_0, window_bounds = array<i64: 24, 120>}, {pipeline_mode = #tpu.pipeline_mode<synchronous>, transform_indices = @transform_1, window_bounds = array<i64: 5, 120, 80>}, {pipeline_mode = #tpu.pipeline_mode<synchronous>, transform_indices = @transform_2, window_bounds = array<i64: 5, 120, 80>}, {pipeline_mode = #tpu.pipeline_mode<synchronous>, transform_indices = @transform_3, window_bounds = array<i64: 1, 80>}, {pipeline_mode = #tpu.pipeline_mode<synchronous>, transform_indices = @transform_4, window_bounds = array<i64: 8, 19>}, {transform_indices = @transform_5, window_bounds = array<i64: 8, 80>}]} {
    %c0 = arith.constant 0 : index
    %c0_0 = arith.constant 0 : index
    %0 = vector.load %arg1[%c0, %c0_0] : memref<24x120xf32, #tpu.memory_space<vmem>>, vector<24x120xf32>
    %cst = arith.constant 0.000000e+00 : f32
    %1 = vector.broadcast %cst : f32 to vector<20x80xf32>
    %cst_1 = arith.constant 0.000000e+00 : f32
    %2 = vector.broadcast %cst_1 : f32 to vector<20x80xf32>
    %3 = vector.extract_strided_slice %0 {offsets = [0, 0], sizes = [20, 120], strides = [1, 1]} : vector<24x120xf32> to vector<20x120xf32>
    %c0_2 = arith.constant 0 : index
    %c0_3 = arith.constant 0 : index
    %c0_4 = arith.constant 0 : index
    %4 = vector.load %arg2[%c0_2, %c0_3, %c0_4] : memref<5x120x80xf32, #tpu.memory_space<vmem>>, vector<1x120x80xf32>
    %5 = vector.shape_cast %4 : vector<1x120x80xf32> to vector<120x80xf32>
    %cst_5 = arith.constant dense<0.000000e+00> : vector<20x80xf32>
    %6 = tpu.matmul %3, %5, %cst_5 {dimension_numbers = #tpu.dot_dimension_numbers<[1], [0], [0], [1], [0, 0, 1, 1], [], []>} : vector<20x120xf32>, vector<120x80xf32>, vector<20x80xf32> -> vector<20x80xf32>
    %7 = arith.addf %1, %6 : vector<20x80xf32>
    %c0_6 = arith.constant 0 : index
    %c0_7 = arith.constant 0 : index
    %c0_8 = arith.constant 0 : index
    %8 = vector.load %arg3[%c0_6, %c0_7, %c0_8] : memref<5x120x80xf32, #tpu.memory_space<vmem>>, vector<1x120x80xf32>
    %9 = vector.shape_cast %8 : vector<1x120x80xf32> to vector<120x80xf32>
    %cst_9 = arith.constant dense<0.000000e+00> : vector<20x80xf32>
    %10 = tpu.matmul %3, %9, %cst_9 {dimension_numbers = #tpu.dot_dimension_numbers<[1], [0], [0], [1], [0, 0, 1, 1], [], []>} : vector<20x120xf32>, vector<120x80xf32>, vector<20x80xf32> -> vector<20x80xf32>
    %11 = arith.addf %2, %10 : vector<20x80xf32>
    %12 = vector.extract_strided_slice %0 {offsets = [1, 0], sizes = [20, 120], strides = [1, 1]} : vector<24x120xf32> to vector<20x120xf32>
    %c1 = arith.constant 1 : index
    %c0_10 = arith.constant 0 : index
    %c0_11 = arith.constant 0 : index
    %13 = vector.load %arg2[%c1, %c0_10, %c0_11] : memref<5x120x80xf32, #tpu.memory_space<vmem>>, vector<1x120x80xf32>
    %14 = vector.shape_cast %13 : vector<1x120x80xf32> to vector<120x80xf32>
    %cst_12 = arith.constant dense<0.000000e+00> : vector<20x80xf32>
    %15 = tpu.matmul %12, %14, %cst_12 {dimension_numbers = #tpu.dot_dimension_numbers<[1], [0], [0], [1], [0, 0, 1, 1], [], []>} : vector<20x120xf32>, vector<120x80xf32>, vector<20x80xf32> -> vector<20x80xf32>
    %16 = arith.addf %7, %15 : vector<20x80xf32>
    %c1_13 = arith.constant 1 : index
    %c0_14 = arith.constant 0 : index
    %c0_15 = arith.constant 0 : index
    %17 = vector.load %arg3[%c1_13, %c0_14, %c0_15] : memref<5x120x80xf32, #tpu.memory_space<vmem>>, vector<1x120x80xf32>
    %18 = vector.shape_cast %17 : vector<1x120x80xf32> to vector<120x80xf32>
    %cst_16 = arith.constant dense<0.000000e+00> : vector<20x80xf32>
    %19 = tpu.matmul %12, %18, %cst_16 {dimension_numbers = #tpu.dot_dimension_numbers<[1], [0], [0], [1], [0, 0, 1, 1], [], []>} : vector<20x120xf32>, vector<120x80xf32>, vector<20x80xf32> -> vector<20x80xf32>
    %20 = arith.addf %11, %19 : vector<20x80xf32>
    %21 = vector.extract_strided_slice %0 {offsets = [2, 0], sizes = [20, 120], strides = [1, 1]} : vector<24x120xf32> to vector<20x120xf32>
    %c2 = arith.constant 2 : index
    %c0_17 = arith.constant 0 : index
    %c0_18 = arith.constant 0 : index
    %22 = vector.load %arg2[%c2, %c0_17, %c0_18] : memref<5x120x80xf32, #tpu.memory_space<vmem>>, vector<1x120x80xf32>
    %23 = vector.shape_cast %22 : vector<1x120x80xf32> to vector<120x80xf32>
    %cst_19 = arith.constant dense<0.000000e+00> : vector<20x80xf32>
    %24 = tpu.matmul %21, %23, %cst_19 {dimension_numbers = #tpu.dot_dimension_numbers<[1], [0], [0], [1], [0, 0, 1, 1], [], []>} : vector<20x120xf32>, vector<120x80xf32>, vector<20x80xf32> -> vector<20x80xf32>
    %25 = arith.addf %16, %24 : vector<20x80xf32>
    %c2_20 = arith.constant 2 : index
    %c0_21 = arith.constant 0 : index
    %c0_22 = arith.constant 0 : index
    %26 = vector.load %arg3[%c2_20, %c0_21, %c0_22] : memref<5x120x80xf32, #tpu.memory_space<vmem>>, vector<1x120x80xf32>
    %27 = vector.shape_cast %26 : vector<1x120x80xf32> to vector<120x80xf32>
    %cst_23 = arith.constant dense<0.000000e+00> : vector<20x80xf32>
    %28 = tpu.matmul %21, %27, %cst_23 {dimension_numbers = #tpu.dot_dimension_numbers<[1], [0], [0], [1], [0, 0, 1, 1], [], []>} : vector<20x120xf32>, vector<120x80xf32>, vector<20x80xf32> -> vector<20x80xf32>
    %29 = arith.addf %20, %28 : vector<20x80xf32>
    %30 = vector.extract_strided_slice %0 {offsets = [3, 0], sizes = [20, 120], strides = [1, 1]} : vector<24x120xf32> to vector<20x120xf32>
    %c3 = arith.constant 3 : index
    %c0_24 = arith.constant 0 : index
    %c0_25 = arith.constant 0 : index
    %31 = vector.load %arg2[%c3, %c0_24, %c0_25] : memref<5x120x80xf32, #tpu.memory_space<vmem>>, vector<1x120x80xf32>
    %32 = vector.shape_cast %31 : vector<1x120x80xf32> to vector<120x80xf32>
    %cst_26 = arith.constant dense<0.000000e+00> : vector<20x80xf32>
    %33 = tpu.matmul %30, %32, %cst_26 {dimension_numbers = #tpu.dot_dimension_numbers<[1], [0], [0], [1], [0, 0, 1, 1], [], []>} : vector<20x120xf32>, vector<120x80xf32>, vector<20x80xf32> -> vector<20x80xf32>
    %34 = arith.addf %25, %33 : vector<20x80xf32>
    %c3_27 = arith.constant 3 : index
    %c0_28 = arith.constant 0 : index
    %c0_29 = arith.constant 0 : index
    %35 = vector.load %arg3[%c3_27, %c0_28, %c0_29] : memref<5x120x80xf32, #tpu.memory_space<vmem>>, vector<1x120x80xf32>
    %36 = vector.shape_cast %35 : vector<1x120x80xf32> to vector<120x80xf32>
    %cst_30 = arith.constant dense<0.000000e+00> : vector<20x80xf32>
    %37 = tpu.matmul %30, %36, %cst_30 {dimension_numbers = #tpu.dot_dimension_numbers<[1], [0], [0], [1], [0, 0, 1, 1], [], []>} : vector<20x120xf32>, vector<120x80xf32>, vector<20x80xf32> -> vector<20x80xf32>
    %38 = arith.addf %29, %37 : vector<20x80xf32>
    %39 = vector.extract_strided_slice %0 {offsets = [4, 0], sizes = [20, 120], strides = [1, 1]} : vector<24x120xf32> to vector<20x120xf32>
    %c4 = arith.constant 4 : index
    %c0_31 = arith.constant 0 : index
    %c0_32 = arith.constant 0 : index
    %40 = vector.load %arg2[%c4, %c0_31, %c0_32] : memref<5x120x80xf32, #tpu.memory_space<vmem>>, vector<1x120x80xf32>
    %41 = vector.shape_cast %40 : vector<1x120x80xf32> to vector<120x80xf32>
    %cst_33 = arith.constant dense<0.000000e+00> : vector<20x80xf32>
    %42 = tpu.matmul %39, %41, %cst_33 {dimension_numbers = #tpu.dot_dimension_numbers<[1], [0], [0], [1], [0, 0, 1, 1], [], []>} : vector<20x120xf32>, vector<120x80xf32>, vector<20x80xf32> -> vector<20x80xf32>
    %43 = arith.addf %34, %42 : vector<20x80xf32>
    %c4_34 = arith.constant 4 : index
    %c0_35 = arith.constant 0 : index
    %c0_36 = arith.constant 0 : index
    %44 = vector.load %arg3[%c4_34, %c0_35, %c0_36] : memref<5x120x80xf32, #tpu.memory_space<vmem>>, vector<1x120x80xf32>
    %45 = vector.shape_cast %44 : vector<1x120x80xf32> to vector<120x80xf32>
    %cst_37 = arith.constant dense<0.000000e+00> : vector<20x80xf32>
    %46 = tpu.matmul %39, %45, %cst_37 {dimension_numbers = #tpu.dot_dimension_numbers<[1], [0], [0], [1], [0, 0, 1, 1], [], []>} : vector<20x120xf32>, vector<120x80xf32>, vector<20x80xf32> -> vector<20x80xf32>
    %47 = arith.addf %38, %46 : vector<20x80xf32>
    %48 = arith.maximumf %43, %47 : vector<20x80xf32>
    %49 = vector.extract_strided_slice %48 {offsets = [0, 0], sizes = [19, 80], strides = [1, 1]} : vector<20x80xf32> to vector<19x80xf32>
    %50 = vector.extract_strided_slice %48 {offsets = [1, 0], sizes = [19, 80], strides = [1, 1]} : vector<20x80xf32> to vector<19x80xf32>
    %51 = arith.maximumf %49, %50 : vector<19x80xf32>
    %c0_38 = arith.constant 0 : index
    %c0_39 = arith.constant 0 : index
    %52 = vector.load %arg5[%c0_38, %c0_39] : memref<8x19xf32, #tpu.memory_space<vmem>>, vector<8x19xf32>
    %cst_40 = arith.constant dense<0.000000e+00> : vector<8x80xf32>
    %53 = tpu.matmul %52, %51, %cst_40 {dimension_numbers = #tpu.dot_dimension_numbers<[1], [0], [0], [1], [0, 0, 1, 1], [], []>} : vector<8x19xf32>, vector<19x80xf32>, vector<8x80xf32> -> vector<8x80xf32>
    %c0_41 = arith.constant 0 : index
    %c0_42 = arith.constant 0 : index
    %54 = vector.load %arg4[%c0_41, %c0_42] : memref<1x80xf32, #tpu.memory_space<vmem>>, vector<1x80xf32>
    %55 = vector.broadcast %54 : vector<1x80xf32> to vector<8x80xf32>
    %56 = arith.addf %53, %55 : vector<8x80xf32>
    %cst_43 = arith.constant 0.000000e+00 : f32
    %57 = vector.broadcast %cst_43 : f32 to vector<8x80xf32>
    %58 = arith.maximumf %56, %57 : vector<8x80xf32>
    %c0_44 = arith.constant 0 : index
    %c0_45 = arith.constant 0 : index
    %59 = vector.load %arg6[%c0_44, %c0_45] : memref<8x80xf32, #tpu.memory_space<vmem>>, vector<8x80xf32>
    tpu.vector_store %arg6[%c0_44, %c0_45], %58 {strides = array<i32>} : memref<8x80xf32, #tpu.memory_space<vmem>>, vector<8x80xf32>,
    return
  }
  func.func @transform_0(%arg0: i32) -> (i32, i32) {
    %c0_i32 = arith.constant 0 : i32
    %c0_i32_0 = arith.constant 0 : i32
    return %arg0, %c0_i32 : i32, i32
  }
  func.func @transform_1(%arg0: i32) -> (i32, i32, i32) {
    %c0_i32 = arith.constant 0 : i32
    %c0_i32_0 = arith.constant 0 : i32
    %c0_i32_1 = arith.constant 0 : i32
    %c0_i32_2 = arith.constant 0 : i32
    return %c0_i32, %c0_i32_0, %c0_i32_1 : i32, i32, i32
  }
  func.func @transform_2(%arg0: i32) -> (i32, i32, i32) {
    %c0_i32 = arith.constant 0 : i32
    %c0_i32_0 = arith.constant 0 : i32
    %c0_i32_1 = arith.constant 0 : i32
    %c0_i32_2 = arith.constant 0 : i32
    return %c0_i32, %c0_i32_0, %c0_i32_1 : i32, i32, i32
  }
  func.func @transform_3(%arg0: i32) -> (i32, i32) {
    %c0_i32 = arith.constant 0 : i32
    %c0_i32_0 = arith.constant 0 : i32
    %c0_i32_1 = arith.constant 0 : i32
    return %c0_i32, %c0_i32_0 : i32, i32
  }
  func.func @transform_4(%arg0: i32) -> (i32, i32) {
    %c0_i32 = arith.constant 0 : i32
    %c0_i32_0 = arith.constant 0 : i32
    %c0_i32_1 = arith.constant 0 : i32
    return %c0_i32, %c0_i32_0 : i32, i32
  }
  func.func @transform_5(%arg0: i32) -> (i32, i32) {
    %c0_i32 = arith.constant 0 : i32
    %c0_i32_0 = arith.constant 0 : i32
    return %arg0, %c0_i32 : i32, i32
  }
}

module attributes {stable_mosaic.version = 11 : i64} {
  func.func @_fc_kernel(%arg0: i32, %arg1: memref<2x320xf32, #tpu.memory_space<vmem>>, %arg2: memref<320x64xf32, #tpu.memory_space<vmem>>, %arg3: memref<1x64xf32, #tpu.memory_space<vmem>>, %arg4: memref<64x128xf32, #tpu.memory_space<vmem>>, %arg5: memref<1x128xf32, #tpu.memory_space<vmem>>, %arg6: memref<2x128xf32, #tpu.memory_space<vmem>>) attributes {dimension_semantics = [#tpu.dimension_semantics<parallel>], iteration_bounds = array<i64: 1>, scalar_prefetch = 0 : i64, scratch_operands = 0 : i64, tpu.core_type = #tpu.core_type<tc>, window_params = [{transform_indices = @transform_0, window_bounds = array<i64: 2, 320>}, {pipeline_mode = #tpu.pipeline_mode<synchronous>, transform_indices = @transform_1, window_bounds = array<i64: 320, 64>}, {pipeline_mode = #tpu.pipeline_mode<synchronous>, transform_indices = @transform_2, window_bounds = array<i64: 1, 64>}, {pipeline_mode = #tpu.pipeline_mode<synchronous>, transform_indices = @transform_3, window_bounds = array<i64: 64, 128>}, {pipeline_mode = #tpu.pipeline_mode<synchronous>, transform_indices = @transform_4, window_bounds = array<i64: 1, 128>}, {transform_indices = @transform_5, window_bounds = array<i64: 2, 128>}]} {
    %c0 = arith.constant 0 : index
    %c0_0 = arith.constant 0 : index
    %0 = vector.load %arg1[%c0, %c0_0] : memref<2x320xf32, #tpu.memory_space<vmem>>, vector<2x320xf32>
    %c0_1 = arith.constant 0 : index
    %c0_2 = arith.constant 0 : index
    %1 = vector.load %arg2[%c0_1, %c0_2] : memref<320x64xf32, #tpu.memory_space<vmem>>, vector<320x64xf32>
    %cst = arith.constant dense<0.000000e+00> : vector<2x64xf32>
    %2 = tpu.matmul %0, %1, %cst {dimension_numbers = #tpu.dot_dimension_numbers<[1], [0], [0], [1], [0, 0, 1, 1], [], []>} : vector<2x320xf32>, vector<320x64xf32>, vector<2x64xf32> -> vector<2x64xf32>
    %c0_3 = arith.constant 0 : index
    %c0_4 = arith.constant 0 : index
    %3 = vector.load %arg3[%c0_3, %c0_4] : memref<1x64xf32, #tpu.memory_space<vmem>>, vector<1x64xf32>
    %4 = vector.broadcast %3 : vector<1x64xf32> to vector<2x64xf32>
    %5 = arith.addf %2, %4 : vector<2x64xf32>
    %cst_5 = arith.constant 0.000000e+00 : f32
    %6 = vector.broadcast %cst_5 : f32 to vector<2x64xf32>
    %7 = arith.maximumf %5, %6 : vector<2x64xf32>
    %c0_6 = arith.constant 0 : index
    %c0_7 = arith.constant 0 : index
    %8 = vector.load %arg4[%c0_6, %c0_7] : memref<64x128xf32, #tpu.memory_space<vmem>>, vector<64x128xf32>
    %cst_8 = arith.constant dense<0.000000e+00> : vector<2x128xf32>
    %9 = tpu.matmul %7, %8, %cst_8 {dimension_numbers = #tpu.dot_dimension_numbers<[1], [0], [0], [1], [0, 0, 1, 1], [], []>} : vector<2x64xf32>, vector<64x128xf32>, vector<2x128xf32> -> vector<2x128xf32>
    %c0_9 = arith.constant 0 : index
    %c0_10 = arith.constant 0 : index
    %10 = vector.load %arg5[%c0_9, %c0_10] : memref<1x128xf32, #tpu.memory_space<vmem>>, vector<1x128xf32>
    %11 = vector.broadcast %10 : vector<1x128xf32> to vector<2x128xf32>
    %12 = arith.addf %9, %11 : vector<2x128xf32>
    %c0_11 = arith.constant 0 : index
    %c0_12 = arith.constant 0 : index
    %13 = vector.load %arg6[%c0_11, %c0_12] : memref<2x128xf32, #tpu.memory_space<vmem>>, vector<2x128xf32>
    tpu.vector_store %arg6[%c0_11, %c0_12], %12 {strides = array<i32>} : memref<2x128xf32, #tpu.memory_space<vmem>>, vector<2x128xf32>,
    return
  }
  func.func @transform_0(%arg0: i32) -> (i32, i32) {
    %c0_i32 = arith.constant 0 : i32
    %c0_i32_0 = arith.constant 0 : i32
    return %arg0, %c0_i32 : i32, i32
  }
  func.func @transform_1(%arg0: i32) -> (i32, i32) {
    %c0_i32 = arith.constant 0 : i32
    %c0_i32_0 = arith.constant 0 : i32
    %c0_i32_1 = arith.constant 0 : i32
    return %c0_i32, %c0_i32_0 : i32, i32
  }
  func.func @transform_2(%arg0: i32) -> (i32, i32) {
    %c0_i32 = arith.constant 0 : i32
    %c0_i32_0 = arith.constant 0 : i32
    %c0_i32_1 = arith.constant 0 : i32
    return %c0_i32, %c0_i32_0 : i32, i32
  }
  func.func @transform_3(%arg0: i32) -> (i32, i32) {
    %c0_i32 = arith.constant 0 : i32
    %c0_i32_0 = arith.constant 0 : i32
    %c0_i32_1 = arith.constant 0 : i32
    return %c0_i32, %c0_i32_0 : i32, i32
  }
  func.func @transform_4(%arg0: i32) -> (i32, i32) {
    %c0_i32 = arith.constant 0 : i32
    %c0_i32_0 = arith.constant 0 : i32
    %c0_i32_1 = arith.constant 0 : i32
    return %c0_i32, %c0_i32_0 : i32, i32
  }
  func.func @transform_5(%arg0: i32) -> (i32, i32) {
    %c0_i32 = arith.constant 0 : i32
    %c0_i32_0 = arith.constant 0 : i32
    return %arg0, %c0_i32 : i32, i32
  }
}

</mosaic_0001>

<bundles_post_ra>
// kernel: net_forward.5
= control target key start
LH: loop header
LB: loop body
LE: loop exit
PB: predicated region body
PF: predicated region fallthrough
CT: control target
= control target key end

     0   :  { %v74_v3 = vlaneseq  ;;  %v516_v8 = vmov 0.0|0.0   ;;  %v517_v9 = vmov 1983009808   ;;  %vm518_vm0 = vmmov 0   ;;  %s730_s0 = inlined_call_operand.vmem [shape: f32[2,320], index: 0, kind: input, shape index: {}]   ;;  %s731_s1 = inlined_call_operand.vmem [shape: f32[320,64], index: 1, kind: input, shape index: {}]   ;;  %s732_s2 = inlined_call_operand.vmem [shape: f32[1,64], index: 2, kind: input, shape index: {}]   ;;  %s733_s3 = inlined_call_operand.vmem [shape: f32[64,128], index: 3, kind: input, shape index: {}]   ;;  %s734_s4 = inlined_call_operand.vmem [shape: f32[1,128], index: 4, kind: input, shape index: {}]   ;;  %s735_s5 = inlined_call_operand.hbm [shape: f32[2,128], index: 5, kind: output, shape index: {}]  }
   0x1   :  { %v38_v0 = vld [vmem:[%s731_s1 + $0x80] sm:$0xff]  ;;  %v39_v1 = vld [vmem:[%s731_s1 + $0x88] sm:$0xff]  ;;  %v40_v6 = vld [vmem:[%s731_s1 + $0x90] sm:$0xff]  ;;  %462 = vmatprep.subr.bf16.mxu1 %v516_v8  ;;  %v72_v10 = vunpack.c.l.s4 %v517_v9  ;;  %v519_v16 = vmov 0.0  }
   0x2   :  { %v22_v2 = vld [vmem:[%s731_s1] sm:$0xff]  ;;  %v430_v4 = vpack.c.bf16 %v39_v1, %v38_v0  ;;  %v23_v5 = vld [vmem:[%s731_s1 + $0x8] sm:$0xff]  ;;  %v41_v7 = vld [vmem:[%s731_s1 + $0x98] sm:$0xff]  ;;  %408 = vmatprep.mubr.msk.f32.mxu1 %vm518_vm0, %v519_v16  ;;  %v75_v23 = vshrl.u32 %v74_v3, 7 }
   0x3   :  { %v432_v11 = vpack.c.bf16 %v23_v5, %v22_v2  ;;  %v434_v12 = vpack.c.bf16 %v41_v7, %v40_v6  ;;  %v24_v13 = vld [vmem:[%s731_s1 + $0x10] sm:$0xff]  ;;  %v25_v14 = vld [vmem:[%s731_s1 + $0x18] sm:$0xff]  ;;  %v42_v15 = vld [vmem:[%s731_s1 + $0xa0] sm:$0xff]  ;;  %v73_v22 = vunpack.c.0.s8 %v72_v10 }
   0x4   :  { %431 = vmatprep.subr.bf16.mxu0 %v430_v4  ;;  %v43_v17 = vld [vmem:[%s731_s1 + $0xa8] sm:$0xff]  ;;  %v436_v18 = vpack.c.bf16 %v25_v14, %v24_v13  ;;  %v26_v20 = vld [vmem:[%s731_s1 + $0x20] sm:$0xff]  ;;  %v44_v24 = vld [vmem:[%s731_s1 + $0xb0] sm:$0xff] }
   0x5   :  { %433 = vmatpush3.bf16.msra.mxu0 %v432_v11  ;;  %v438_v19 = vpack.c.bf16 %v43_v17, %v42_v15  ;;  %v27_v21 = vld [vmem:[%s731_s1 + $0x28] sm:$0xff]  ;;  %v45_v25 = vld [vmem:[%s731_s1 + $0xb8] sm:$0xff]  ;;  %v54_v27 = vld [vmem:[%s731_s1 + $0x100] sm:$0xff]  ;;  %v76_v34 = vsub.s32 %v73_v22, %v75_v23 }
   0x6   :  { %435 = vmatprep.subr.bf16.mxu0 %v434_v12  ;;  %v440_v26 = vpack.c.bf16 %v27_v21, %v26_v20  ;;  %v55_v28 = vld [vmem:[%s731_s1 + $0x108] sm:$0xff]  ;;  %v442_v29 = vpack.c.bf16 %v45_v25, %v44_v24  ;;  %v28_v30 = vld [vmem:[%s731_s1 + $0x30] sm:$0xff]  ;;  %v29_v31 = vld [vmem:[%s731_s1 + $0x38] sm:$0xff] }
   0x7   :  { %v46_v32 = vld [vmem:[%s731_s1 + $0xc0] sm:$0xff]  ;;  %v463_v33 = vpack.c.bf16 %v55_v28, %v54_v27  ;;  %v47_v35 = vld [vmem:[%s731_s1 + $0xc8] sm:$0xff]  ;;  %v56_v36 = vld [vmem:[%s731_s1 + $0x110] sm:$0xff]  ;;  %v444_v39 = vpack.c.bf16 %v29_v31, %v28_v30 }
   0x8   :  { %v57_v37 = vld [vmem:[%s731_s1 + $0x118] sm:$0xff]  ;;  %v58_v40 = vld [vmem:[%s731_s1 + $0x120] sm:$0xff]  ;;  %v59_v41 = vld [vmem:[%s731_s1 + $0x128] sm:$0xff]  ;;  %v446_v43 = vpack.c.bf16 %v47_v35, %v46_v32 }
   0x9   :  { %437 = vmatpush3.bf16.msra.mxu0 %v436_v18  ;;  %464 = vmatpush3.bf16.msra.mxu1 %v463_v33  ;;  %v466_v38 = vpack.c.bf16 %v57_v37, %v56_v36  ;;  %v21_v42 = vld [vmem:[%s730_s0] sm:$0x3f]  ;;  %v31_v45 = vld [vmem:[%s731_s1 + $0x48] sm:$0xff]  ;;  %v48_v47 = vld [vmem:[%s731_s1 + $0xd0] sm:$0xff]  ;;  %v469_v49 = vpack.c.bf16 %v59_v41, %v58_v40 }
   0xa   :  { %439 = vmatprep.subr.bf16.mxu0 %v438_v19  ;;  %465 = vmatprep.subr.bf16.mxu1 %v516_v8  ;;  %v30_v44 = vld [vmem:[%s731_s1 + $0x40] sm:$0xff]  ;;  %v77_v46 = vrot.slane %v21_v42, %v76_v34  ;;  %v49_v48 = vld [vmem:[%s731_s1 + $0xd8] sm:$0xff] }
   0xc   :  { %v85_v50 = vcombine.high %v77_v46, %v77_v46 }
   0xd   :  { %441 = vmatpush3.bf16.msra.mxu0 %v440_v26  ;;  %467 = vmatpush3.bf16.msra.mxu1 %v466_v38 }
   0xe   :  { %443 = vmatprep.subr.bf16.mxu0 %v442_v29 }
   0xf   :  { %10 = vsyncpa [#allocation3], 0  ;;  %v448_v51 = vpack.c.bf16 %v31_v45, %v30_v44  ;;  %468 = vmatprep.subr.bf16.mxu1 %v516_v8  ;;  %v60_v52 = vld [vmem:[%s731_s1 + $0x130] sm:$0xff]  ;;  %v61_v53 = vld [vmem:[%s731_s1 + $0x138] sm:$0xff]  ;;  %v450_v54 = vpack.c.bf16 %v49_v48, %v48_v47  ;;  %155 = vmatprep.mubr.f32.mxu0 %v85_v50  ;;  %v70_v59 = vcombine.high %v21_v42, %v21_v42  ;;  %vm88_vm1 = vcmask 523264  }
  0x10   :  { %v32_v55 = vld [vmem:[%s731_s1 + $0x50] sm:$0xff]  ;;  %v33_v56 = vld [vmem:[%s731_s1 + $0x58] sm:$0xff]  ;;  %v50_v57 = vld [vmem:[%s731_s1 + $0xe0] sm:$0xff]  ;;  %v472_v60 = vpack.c.bf16 %v61_v53, %v60_v52 }
  0x11   :  { %445 = vmatpush3.bf16.msra.mxu0 %v444_v39  ;;  %v51_v58 = vld [vmem:[%s731_s1 + $0xe8] sm:$0xff]  ;;  %470 = vmatpush3.bf16.msra.mxu1 %v469_v49  ;;  %v452_v61 = vpack.c.bf16 %v33_v56, %v32_v55  ;;  %v232_v62 = vld [vmem:[%s733_s3] sm:$0xff]  ;;  %v52_v3 = vld [vmem:[%s731_s1 + $0xf0] sm:$0xff]  ;;  %v84_v5 = vrot.slane %v70_v59, %v76_v34 }
  0x12   :  { %447 = vmatprep.subr.bf16.mxu0 %v446_v43  ;;  %471 = vmatprep.subr.bf16.mxu1 %v516_v8  ;;  %v233_v63 = vld [vmem:[%s733_s3 + $0x8] sm:$0xff]  ;;  %v454_v0 = vpack.c.bf16 %v51_v58, %v50_v57  ;;  %v34_v1 = vld [vmem:[%s731_s1 + $0x60] sm:$0xff]  ;;  %v53_v4 = vld [vmem:[%s731_s1 + $0xf8] sm:$0xff] }
  0x13   :  { %v35_v2 = vld [vmem:[%s731_s1 + $0x68] sm:$0xff]  ;;  %v475_v6 = vpack.c.bf16 %v233_v63, %v232_v62  ;;  %v234_v9 = vld [vmem:[%s733_s3 + $0x10] sm:$0xff]  ;;  %v235_v10 = vld [vmem:[%s733_s3 + $0x18] sm:$0xff]  ;;  %v458_v11 = vpack.c.bf16 %v53_v4, %v52_v3 }
  0x14   :  { %v456_v7 = vpack.c.bf16 %v35_v2, %v34_v1  ;;  %v36_v12 = vld [vmem:[%s731_s1 + $0x70] sm:$0xff]  ;;  %v37_v13 = vld [vmem:[%s731_s1 + $0x78] sm:$0xff]  ;;  %v478_v14 = vpack.c.bf16 %v235_v10, %v234_v9  ;;  %v236_v17 = vld [vmem:[%s733_s3 + $0x20] sm:$0xff] }
  0x15   :  { %449 = vmatpush3.bf16.msra.mxu0 %v448_v51  ;;  %473 = vmatpush3.bf16.msra.mxu1 %v472_v60  ;;  %v460_v15 = vpack.c.bf16 %v37_v13, %v36_v12  ;;  %v237_v18 = vld [vmem:[%s733_s3 + $0x28] sm:$0xff]  ;;  %v239_v20 = vld [vmem:[%s733_s3 + $0x38] sm:$0xff]  ;;  %v335_v26 = vld [vmem:[%s732_s2] ss:$0 sm:$0xff] }
  0x16   :  { %451 = vmatprep.subr.bf16.mxu0 %v450_v54  ;;  %474 = vmatprep.subr.bf16.mxu1 %v516_v8  ;;  %v481_v19 = vpack.c.bf16 %v237_v18, %v236_v17  ;;  %v337_v30 = vld [vmem:[%s734_s4] ss:$0 sm:$0xff] }
  0x18   :  { %409 = vmatmul.mubr.msk.f32.vlgmr.msra.gmra.mrb[0].mxu1 %vm88_vm1, %v84_v5 }
  0x19   :  { %453 = vmatpush3.bf16.msra.mxu0 %v452_v61  ;;  %476 = vmatpush3.bf16.msra.mxu1 %v475_v6 }
  0x1a   :  { %455 = vmatprep.subr.bf16.mxu0 %v454_v0  ;;  %427 = vmatprep.mubr.msk.f32.mxu1 %vm518_vm0, %v519_v16  ;;  %v238_v16 = vld [vmem:[%s733_s3 + $0x30] sm:$0xff]  ;;  %s520_s3 = smov [#allocation2]  }
  0x1b   :  { %477 = vmatprep.subr.bf16.mxu1 %v516_v8  ;;  %v484_v21 = vpack.c.bf16 %v239_v20, %v238_v16  ;;  %s327_s17 = sshll.u32 %s520_s3, 4  ;;  %s328_s17 = int_to_ptr.vmem [resolvable:$true] %s327_s17 }
  0x1c   :  { %s492_s18 = scalar_lea.vmem %s328_s17, 32  ;;  %p497_p1 = scmp.lt.s32.totalorder %s328_s17, %s328_s17 }
  0x1d   :  { %457 = vmatpush3.bf16.msra.mxu0 %v456_v7  ;;  %479 = vmatpush3.bf16.msra.mxu1 %v478_v14  ;;  %p493_p0 = scmp.ne.s32.totalorder %s328_s17, %s492_s18  ;;  %p498_p2 = scmp.lt.s32.totalorder %s492_s18, %s492_s18 }
  0x1e   :  { %459 = vmatprep.subr.bf16.mxu0 %v458_v11  ;;  %480 = vmatprep.subr.bf16.mxu1 %v516_v8 }
  0x1f   :  { %p499_p3 = por %p498_p2, %p497_p1 }
  0x21   :  { %461 = vmatpush3.bf16.msra.mxu0 %v460_v15  ;;  %482 = vmatpush3.bf16.msra.mxu1 %v481_v19  ;;  %p500_p4 = pnand %p499_p3, %p493_p0 }
  0x22   :  { %483 = vmatprep.subr.bf16.mxu1 %v516_v8 }
  0x24   :  { %156 = vmatmul.mubr.f32.vlgmr.msra.gmra.mrb[0].mxu0 %v77_v46 }
  0x25   :  { %485 = vmatpush3.bf16.msra.mxu1 %v484_v21 }
  0xeb   :  { %v227_v22 = vpop.f32.mrb[0].mxu1 }
  0xec   :  { %v410_v23 = vpop.f32.mrb[1].mxu1 }
  0xf7   :  { %v371_v24 = vpop.f32.mrb[0].mxu0 }
  0xf8   :  { %v372_v25 = vpop.f32.mrb[1].mxu0 }
  0xf9   :  { %v373_v27 = vadd.f32 %v372_v25, %v371_v24 }
  0xfb   :  { %v158_v8 = vadd.f32 %v373_v27, %v335_v26 }
  0xfd   :  { %v228_v28 = vadd.f32 %v227_v22, %v158_v8 }
  0xff   :  { %v231_v29 = vmax.f32 %v228_v28, 0.0 }
 0x101   :  { %428 = vmatmul.mubr.msk.f32.vlgmr.msra.gmra.mrb[2].mxu1 %vm88_vm1, %v231_v29 }
 0x1d4   :  { %v316_v31 = vpop.f32.mrb[2].mxu1 }
 0x1d5   :  { %v317_v32 = vadd.f32 %v337_v30, %v316_v31  ;;  %v429_v33 = vpop.f32.mrb[3].mxu1 }
 0x1d7   :  { %320 = vst [vmem:[#allocation2] sm:$0x3] %v317_v32 }
 0x1d8   :  { %503 = shalt.err (!%p500_p4)
}
 0x1d9   :  { %s504_s20 = scalar_lea.hbm %s735_s5, 32 }
 0x1da   :  { %p505_p5 = scmp.ne.s32.totalorder %s735_s5, %s504_s20  ;;  %p508_p6 = scmp.lt.u32.totalorder %s504_s20, %s735_s5 }
 0x1dc   :  { %p510_p7 = pnand %p508_p6, %p505_p5 }
 0x1de   :  { %513 = shalt.err (!%p510_p7)
}
 0x1df   :  { %330 = dma.vmem_to_hbm [thread:$0]  %s328_s17, 32, %s735_s5, [#allocation3]  }
 0x1e0   :  { %514 = dma.done.wait [#allocation3], 32  }
 0x1e1   :  { %515 = vsyncadd [#allocation3], 4294967264 }
 0x1e2   :  { %334 = vsyncpa [#allocation3], 1 }

// kernel: net_forward.4
= control target key start
LH: loop header
LB: loop body
LE: loop exit
PB: predicated region body
PF: predicated region fallthrough
CT: control target
= control target key end

     0   :  { %v2167_v0 = vmov 0.0|0.0   ;;  %vm2168_vm0 = vmmov 0   ;;  %v2169_v8 = vmov 0.0   ;;  %vm653_vm1 = vcmask 1044480   ;;  %s2902_s1 = inlined_call_operand.vmem [shape: f32[5,120,80], index: 1, kind: input, shape index: {}]   ;;  %s2903_s2 = inlined_call_operand.vmem [shape: f32[5,120,80], index: 2, kind: input, shape index: {}]   ;;  %s2904_s0 = inlined_call_operand.vmem [shape: f32[24,120], index: 0, kind: input, shape index: {}]   ;;  %s2905_s4 = inlined_call_operand.vmem [shape: f32[8,19], index: 4, kind: input, shape index: {}]   ;;  %s2906_s3 = inlined_call_operand.vmem [shape: f32[1,80], index: 3, kind: input, shape index: {}]   ;;  %s2907_s5 = inlined_call_operand.vmem [shape: f32[8,80], index: 5, kind: output, shape index: {}]  }
   0x1   :  { %1903 = vmatprep.subr.bf16.mxu0 %v2167_v0  ;;  %1945 = vmatprep.subr.bf16.mxu1 %v2167_v0  ;;  %v1167_v1 = vld [vmem:[%s2902_s1 + $0x78] sm:$0xff]  ;;  %v1168_v2 = vld [vmem:[%s2902_s1 + $0x80] sm:$0xff]  ;;  %v1169_v6 = vld [vmem:[%s2902_s1 + $0x88] sm:$0xff]  ;;  %vm72_vm2 = vcmask 1046528   ;;  %vm863_vm3 = vcmask 1043456   ;;  %vm78_vm4 = vcmask 982016  }
   0x2   :  { %v1188_v3 = vld [vmem:[%s2903_s2 + $0x78] sm:$0xff]  ;;  %v1904_v4 = vpack.c.bf16 %v1168_v2, %v1167_v1  ;;  %v1189_v5 = vld [vmem:[%s2903_s2 + $0x80] sm:$0xff]  ;;  %v1170_v7 = vld [vmem:[%s2902_s1 + $0x90] sm:$0xff]  ;;  %1534 = vmatprep.mubr.msk.f32.mxu0 %vm2168_vm0, %v2169_v8  ;;  %1612 = vmatprep.mubr.msk.f32.mxu1 %vm2168_vm0, %v2169_v8  ;;  %vm443_vm5 = vcmask 1045504   ;;  %vm1086_vm6 = vcmask 1042432   ;;  %vm1082_vm7 = vcmask 154624  }
   0x3   :  { %v1946_v9 = vpack.c.bf16 %v1189_v5, %v1188_v3  ;;  %v1190_v10 = vld [vmem:[%s2903_s2 + $0x88] sm:$0xff]  ;;  %v1191_v11 = vld [vmem:[%s2903_s2 + $0x90] sm:$0xff]  ;;  %v1907_v12 = vpack.c.bf16 %v1170_v7, %v1169_v6  ;;  %v1171_v14 = vld [vmem:[%s2902_s1 + $0x98] sm:$0xff]  ;;  %vm1161_vm8 = vcmask 654336  }
   0x4   :  { %1905 = vmatpush3.bf16.msra.mxu0 %v1904_v4  ;;  %v1949_v13 = vpack.c.bf16 %v1191_v11, %v1190_v10  ;;  %v1172_v15 = vld [vmem:[%s2902_s1 + $0xa0] sm:$0xff]  ;;  %v1192_v16 = vld [vmem:[%s2903_s2 + $0x98] sm:$0xff]  ;;  %v1173_v20 = vld [vmem:[%s2902_s1 + $0xa8] sm:$0xff] }
   0x5   :  { %1947 = vmatpush3.bf16.msra.mxu1 %v1946_v9  ;;  %1906 = vmatprep.subr.bf16.mxu0 %v2167_v0  ;;  %v1193_v17 = vld [vmem:[%s2903_s2 + $0xa0] sm:$0xff]  ;;  %v1910_v18 = vpack.c.bf16 %v1172_v15, %v1171_v14  ;;  %v1174_v21 = vld [vmem:[%s2902_s1 + $0xb0] sm:$0xff]  ;;  %v1194_v22 = vld [vmem:[%s2903_s2 + $0xa8] sm:$0xff] }
   0x6   :  { %1948 = vmatprep.subr.bf16.mxu1 %v2167_v0  ;;  %v1952_v19 = vpack.c.bf16 %v1193_v17, %v1192_v16  ;;  %v1195_v23 = vld [vmem:[%s2903_s2 + $0xb0] sm:$0xff]  ;;  %v1913_v24 = vpack.c.bf16 %v1174_v21, %v1173_v20  ;;  %v2261_v25 = vld [vmem:[%s2904_s0] sm:$0xff]  ;;  %v1175_v27 = vld [vmem:[%s2902_s1 + $0xb8] sm:$0xff] }
   0x7   :  { %v1955_v26 = vpack.c.bf16 %v1195_v23, %v1194_v22  ;;  %v1176_v28 = vld [vmem:[%s2902_s1 + $0xc0] sm:$0xff]  ;;  %v2273_v29 = vld [vmem:[%s2904_s0 + $0x8] sm:$0xff]  ;;  %v654_v30 = vrot.slane %v2261_v25, 3  ;;  %v1196_v31 = vld [vmem:[%s2903_s2 + $0xb8] sm:$0xff]  ;;  %v73_v52 = vrot.slane %v2261_v25, 1  ;;  %v864_v54 = vrot.slane %v2261_v25, 4 }
   0x8   :  { %1908 = vmatpush3.bf16.msra.mxu0 %v1907_v12  ;;  %v1197_v32 = vld [vmem:[%s2903_s2 + $0xc0] sm:$0xff]  ;;  %v655_v33 = vrot.slane %v2273_v29, 3  ;;  %v1916_v34 = vpack.c.bf16 %v1176_v28, %v1175_v27  ;;  %v1177_v37 = vld [vmem:[%s2902_s1 + $0xc8] sm:$0xff]  ;;  %v1178_v38 = vld [vmem:[%s2902_s1 + $0xd0] sm:$0xff]  ;;  %v74_v53 = vrot.slane %v2273_v29, 1  ;;  %v865_v55 = vrot.slane %v2273_v29, 4 }
   0x9   :  { %1950 = vmatpush3.bf16.msra.mxu1 %v1949_v13  ;;  %1909 = vmatprep.subr.bf16.mxu0 %v2167_v0  ;;  %v1958_v36 = vpack.c.bf16 %v1197_v32, %v1196_v31  ;;  %v1198_v39 = vld [vmem:[%s2903_s2 + $0xc8] sm:$0xff]  ;;  %v1199_v40 = vld [vmem:[%s2903_s2 + $0xd0] sm:$0xff]  ;;  %v1919_v42 = vpack.c.bf16 %v1178_v38, %v1177_v37  ;;  %v1179_v45 = vld [vmem:[%s2902_s1 + $0xd8] sm:$0xff] }
   0xa   :  { %1951 = vmatprep.subr.bf16.mxu1 %v2167_v0  ;;  %v2285_v35 = vsel %vm653_vm1, %v654_v30, %v655_v33  ;;  %v2304_v41 = vld [vmem:[%s2904_s0 + $0x10] sm:$0xff]  ;;  %v1961_v44 = vpack.c.bf16 %v1199_v40, %v1198_v39  ;;  %v1180_v46 = vld [vmem:[%s2902_s1 + $0xe0] sm:$0xff]  ;;  %v1200_v47 = vld [vmem:[%s2903_s2 + $0xd8] sm:$0xff]  ;;  %v2350_v61 = vsel %vm863_vm3, %v864_v54, %v865_v55  ;;  %v75_v63 = vsel %vm72_vm2, %v73_v52, %v74_v53 }
   0xb   :  { %v2307_v43 = vrot.slane %v2304_v41, 3  ;;  %v1201_v48 = vld [vmem:[%s2903_s2 + $0xe0] sm:$0xff]  ;;  %v1922_v50 = vpack.c.bf16 %v1180_v46, %v1179_v45  ;;  %v24_v57 = vld [vmem:[%s2902_s1 + $0x8] sm:$0xff]  ;;  %v76_v2 = vrot.slane %v2304_v41, 1  ;;  %v2359_v3 = vrot.slane %v2304_v41, 4  ;;  %v25_v5 = vld [vmem:[%s2902_s1 + $0x10] sm:$0xff] }
   0xc   :  { %1911 = vmatpush3.bf16.msra.mxu0 %v1910_v18  ;;  %v1964_v51 = vpack.c.bf16 %v1201_v48, %v1200_v47  ;;  %v23_v56 = vld [vmem:[%s2902_s1] sm:$0xff]  ;;  %v1181_v58 = vld [vmem:[%s2902_s1 + $0xe8] sm:$0xff]  ;;  %v26_v6 = vld [vmem:[%s2902_s1 + $0x18] sm:$0xff] }
   0xd   :  { %1953 = vmatpush3.bf16.msra.mxu1 %v1952_v19  ;;  %1912 = vmatprep.subr.bf16.mxu0 %v2167_v0  ;;  %v2325_v49 = vsel %vm653_vm1, %v655_v33, %v2307_v43  ;;  %v38_v59 = vld [vmem:[%s2903_s2] sm:$0xff]  ;;  %v39_v60 = vld [vmem:[%s2903_s2 + $0x8] sm:$0xff]  ;;  %v1925_v1 = vpack.c.bf16 %v24_v57, %v23_v56  ;;  %v40_v7 = vld [vmem:[%s2903_s2 + $0x10] sm:$0xff]  ;;  %v2376_v10 = vsel %vm863_vm3, %v865_v55, %v2359_v3 }
   0xe   :  { %1954 = vmatprep.subr.bf16.mxu1 %v2167_v0  ;;  %v1202_v62 = vld [vmem:[%s2903_s2 + $0xe8] sm:$0xff]  ;;  %v1967_v4 = vpack.c.bf16 %v39_v60, %v38_v59  ;;  %v41_v9 = vld [vmem:[%s2903_s2 + $0x18] sm:$0xff]  ;;  %v1928_v11 = vpack.c.bf16 %v26_v6, %v25_v5  ;;  %v77_v12 = vsel %vm72_vm2, %v74_v53, %v76_v2  ;;  %v27_v14 = vld [vmem:[%s2902_s1 + $0x20] sm:$0xff] }
   0xf   :  { %v1970_v13 = vpack.c.bf16 %v41_v9, %v40_v7  ;;  %v28_v15 = vld [vmem:[%s2902_s1 + $0x28] sm:$0xff]  ;;  %v42_v16 = vld [vmem:[%s2903_s2 + $0x20] sm:$0xff]  ;;  %v29_v20 = vld [vmem:[%s2902_s1 + $0x30] sm:$0xff] }
  0x10   :  { %1914 = vmatpush3.bf16.msra.mxu0 %v1913_v24  ;;  %v43_v17 = vld [vmem:[%s2903_s2 + $0x28] sm:$0xff]  ;;  %v1931_v18 = vpack.c.bf16 %v28_v15, %v27_v14  ;;  %v30_v21 = vld [vmem:[%s2902_s1 + $0x38] sm:$0xff]  ;;  %v44_v22 = vld [vmem:[%s2903_s2 + $0x30] sm:$0xff] }
  0x11   :  { %1956 = vmatpush3.bf16.msra.mxu1 %v1955_v26  ;;  %1915 = vmatprep.subr.bf16.mxu0 %v2167_v0  ;;  %v1973_v19 = vpack.c.bf16 %v43_v17, %v42_v16  ;;  %v45_v23 = vld [vmem:[%s2903_s2 + $0x38] sm:$0xff]  ;;  %v1934_v24 = vpack.c.bf16 %v30_v21, %v29_v20  ;;  %v31_v27 = vld [vmem:[%s2902_s1 + $0x40] sm:$0xff]  ;;  %v32_v28 = vld [vmem:[%s2902_s1 + $0x48] sm:$0xff] }
  0x12   :  { %1957 = vmatprep.subr.bf16.mxu1 %v2167_v0  ;;  %v1976_v26 = vpack.c.bf16 %v45_v23, %v44_v22  ;;  %v46_v30 = vld [vmem:[%s2903_s2 + $0x40] sm:$0xff]  ;;  %v47_v31 = vld [vmem:[%s2903_s2 + $0x48] sm:$0xff]  ;;  %v1937_v32 = vpack.c.bf16 %v32_v28, %v31_v27  ;;  %v48_v37 = vld [vmem:[%s2903_s2 + $0x50] sm:$0xff] }
  0x13   :  { %v1979_v33 = vpack.c.bf16 %v47_v31, %v46_v30  ;;  %v49_v38 = vld [vmem:[%s2903_s2 + $0x58] sm:$0xff]  ;;  %v50_v45 = vld [vmem:[%s2903_s2 + $0x60] sm:$0xff]  ;;  %v51_v46 = vld [vmem:[%s2903_s2 + $0x68] sm:$0xff] }
  0x14   :  { %1917 = vmatpush3.bf16.msra.mxu0 %v1916_v34  ;;  %v33_v34 = vld [vmem:[%s2902_s1 + $0x50] sm:$0xff]  ;;  %v1982_v40 = vpack.c.bf16 %v49_v38, %v48_v37  ;;  %v1985_v48 = vpack.c.bf16 %v51_v46, %v50_v45  ;;  %v1228_v54 = vld [vmem:[%s2903_s2 + $0xf8] sm:$0xff]  ;;  %v1212_v59 = vld [vmem:[%s2902_s1 + $0x108] sm:$0xff]  ;;  %v444_v38 = vrot.slane %v2261_v25, 2 }
  0x15   :  { %1959 = vmatpush3.bf16.msra.mxu1 %v1958_v36  ;;  %1918 = vmatprep.subr.bf16.mxu0 %v2167_v0  ;;  %v34_v36 = vld [vmem:[%s2902_s1 + $0x58] sm:$0xff]  ;;  %v37_v52 = vld [vmem:[%s2902_s1 + $0x70] sm:$0xff]  ;;  %v1229_v60 = vld [vmem:[%s2903_s2 + $0x100] sm:$0xff] }
  0x16   :  { %1960 = vmatprep.subr.bf16.mxu1 %v2167_v0  ;;  %v1940_v39 = vpack.c.bf16 %v34_v36, %v33_v34  ;;  %v1227_v53 = vld [vmem:[%s2903_s2 + $0xf0] sm:$0xff]  ;;  %v1232_v6 = vld [vmem:[%s2903_s2 + $0x118] sm:$0xff]  ;;  %v1234_v14 = vld [vmem:[%s2903_s2 + $0x128] sm:$0xff] }
  0x17   :  { %v52_v55 = vld [vmem:[%s2903_s2 + $0x70] sm:$0xff]  ;;  %v2009_v57 = vpack.c.bf16 %v1228_v54, %v1227_v53  ;;  %v1236_v20 = vld [vmem:[%s2903_s2 + $0x138] sm:$0xff]  ;;  %v1219_v23 = vld [vmem:[%s2902_s1 + $0x140] sm:$0xff] }
  0x18   :  { %1920 = vmatpush3.bf16.msra.mxu0 %v1919_v42  ;;  %v35_v42 = vld [vmem:[%s2902_s1 + $0x60] sm:$0xff]  ;;  %v1231_v5 = vld [vmem:[%s2903_s2 + $0x110] sm:$0xff]  ;;  %v1238_v27 = vld [vmem:[%s2903_s2 + $0x148] sm:$0xff] }
  0x19   :  { %1962 = vmatpush3.bf16.msra.mxu1 %v1961_v44  ;;  %1921 = vmatprep.subr.bf16.mxu0 %v2167_v0  ;;  %v36_v44 = vld [vmem:[%s2902_s1 + $0x68] sm:$0xff]  ;;  %v2015_v9 = vpack.c.bf16 %v1232_v6, %v1231_v5  ;;  %v1217_v17 = vld [vmem:[%s2902_s1 + $0x130] sm:$0xff]  ;;  %v1240_v34 = vld [vmem:[%s2903_s2 + $0x158] sm:$0xff] }
  0x1a   :  { %1963 = vmatprep.subr.bf16.mxu1 %v2167_v0  ;;  %v1943_v47 = vpack.c.bf16 %v36_v44, %v35_v42  ;;  %v1221_v31 = vld [vmem:[%s2902_s1 + $0x150] sm:$0xff]  ;;  %v1223_v44 = vld [vmem:[%s2902_s1 + $0x160] sm:$0xff]  ;;  %v1265_v53 = vld [vmem:[%s2903_s2 + $0x178] sm:$0xff] }
  0x1b   :  { %v1246_v42 = vld [vmem:[%s2902_s1 + $0x170] sm:$0xff]  ;;  %v1241_v45 = vld [vmem:[%s2903_s2 + $0x160] sm:$0xff] }
  0x1c   :  { %1923 = vmatpush3.bf16.msra.mxu0 %v1922_v50  ;;  %v1209_v50 = vld [vmem:[%s2902_s1 + $0xf0] sm:$0xff]  ;;  %v1270_v5 = vld [vmem:[%s2903_s2 + $0x1a0] sm:$0xff] }
  0x1d   :  { %1965 = vmatpush3.bf16.msra.mxu1 %v1964_v51  ;;  %1532 = vmatprep.subr.mxu0 %v2169_v8  ;;  %v1210_v51 = vld [vmem:[%s2902_s1 + $0xf8] sm:$0xff] }
  0x1e   :  { %1610 = vmatprep.subr.mxu1 %v2169_v8  ;;  %v1988_v56 = vpack.c.bf16 %v1210_v51, %v1209_v50  ;;  %v1247_v51 = vld [vmem:[%s2902_s1 + $0x178] sm:$0xff] }
  0x20   :  { %1533 = vmatpush3.msra.mxu0 %v1181_v58  ;;  %v1211_v58 = vld [vmem:[%s2902_s1 + $0x100] sm:$0xff] }
  0x21   :  { %1611 = vmatpush3.msra.mxu1 %v1202_v62  ;;  %1924 = vmatprep.subr.bf16.mxu0 %v2167_v0  ;;  %v1230_v62 = vld [vmem:[%s2903_s2 + $0x108] sm:$0xff] }
  0x22   :  { %1966 = vmatprep.subr.bf16.mxu1 %v2167_v0  ;;  %1535 = vmatmul.mubr.msk.f32.vlgmr.msra.gmra.mrb[0].mxu0 %vm78_vm4, %v75_v63 }
  0x23   :  { %1926 = vmatpush3.bf16.msra.mxu0 %v1925_v1  ;;  %1613 = vmatmul.mubr.msk.f32.vlgmr.msra.gmra.mrb[0].mxu1 %vm78_vm4, %v75_v63  ;;  %v1991_v63 = vpack.c.bf16 %v1212_v59, %v1211_v58  ;;  %v2012_v1 = vpack.c.bf16 %v1230_v62, %v1229_v60  ;;  %v1250_v58 = vld [vmem:[%s2902_s1 + $0x190] sm:$0xff]  ;;  %v1267_v59 = vld [vmem:[%s2903_s2 + $0x188] sm:$0xff] }
  0x24   :  { %1968 = vmatpush3.bf16.msra.mxu1 %v1967_v4  ;;  %1927 = vmatprep.subr.bf16.mxu0 %v2167_v0  ;;  %v1214_v4 = vld [vmem:[%s2902_s1 + $0x118] sm:$0xff]  ;;  %v1268_v60 = vld [vmem:[%s2903_s2 + $0x190] sm:$0xff] }
  0x25   :  { %1969 = vmatprep.subr.bf16.mxu1 %v2167_v0  ;;  %1537 = vmatprep.mubr.msk.f32.mxu0 %vm2168_vm0, %v2169_v8 }
  0x26   :  { %1615 = vmatprep.mubr.msk.f32.mxu1 %vm2168_vm0, %v2169_v8  ;;  %1538 = vmatmul.mubr.msk.f32.gmra.mrb[2].mxu0 %vm78_vm4, %v77_v12 }
  0x27   :  { %1929 = vmatpush3.bf16.msra.mxu0 %v1928_v11  ;;  %1616 = vmatmul.mubr.msk.f32.gmra.mrb[2].mxu1 %vm78_vm4, %v77_v12  ;;  %v1215_v11 = vld [vmem:[%s2902_s1 + $0x120] sm:$0xff]  ;;  %v1216_v12 = vld [vmem:[%s2902_s1 + $0x128] sm:$0xff] }
  0x28   :  { %1971 = vmatpush3.bf16.msra.mxu1 %v1970_v13  ;;  %1930 = vmatprep.subr.bf16.mxu0 %v2167_v0  ;;  %v1233_v13 = vld [vmem:[%s2903_s2 + $0x120] sm:$0xff]  ;;  %v1997_v15 = vpack.c.bf16 %v1216_v12, %v1215_v11  ;;  %v1254_v11 = vld [vmem:[%s2902_s1 + $0x1b0] sm:$0xff]  ;;  %v1271_v12 = vld [vmem:[%s2903_s2 + $0x1a8] sm:$0xff] }
  0x29   :  { %1972 = vmatprep.subr.bf16.mxu1 %v2167_v0  ;;  %1540 = vmatprep.mubr.msk.f32.mxu0 %vm2168_vm0, %v2169_v8  ;;  %v2018_v16 = vpack.c.bf16 %v1234_v14, %v1233_v13  ;;  %v1272_v13 = vld [vmem:[%s2903_s2 + $0x1b0] sm:$0xff] }
  0x2a   :  { %1618 = vmatprep.mubr.msk.f32.mxu1 %vm2168_vm0, %v2169_v8  ;;  %1541 = vmatmul.mubr.msk.f32.gmra.mrb[4].mxu0 %vm78_vm4, %v76_v2 }
  0x2b   :  { %1932 = vmatpush3.bf16.msra.mxu0 %v1931_v18  ;;  %1619 = vmatmul.mubr.msk.f32.gmra.mrb[4].mxu1 %vm78_vm4, %v76_v2  ;;  %v1213_v2 = vld [vmem:[%s2902_s1 + $0x110] sm:$0xff]  ;;  %v1218_v18 = vld [vmem:[%s2902_s1 + $0x138] sm:$0xff] }
  0x2c   :  { %1974 = vmatpush3.bf16.msra.mxu1 %v1973_v19  ;;  %1933 = vmatprep.subr.bf16.mxu0 %v2167_v0  ;;  %v1994_v7 = vpack.c.bf16 %v1214_v4, %v1213_v2  ;;  %v1235_v19 = vld [vmem:[%s2903_s2 + $0x130] sm:$0xff]  ;;  %v2000_v21 = vpack.c.bf16 %v1218_v18, %v1217_v17  ;;  %v1252_v2 = vld [vmem:[%s2902_s1 + $0x1a0] sm:$0xff]  ;;  %v1269_v4 = vld [vmem:[%s2903_s2 + $0x198] sm:$0xff] }
  0x2d   :  { %1975 = vmatprep.subr.bf16.mxu1 %v2167_v0  ;;  %1573 = vmatprep.mubr.msk.f32.mxu0 %vm2168_vm0, %v2169_v8  ;;  %v2021_v22 = vpack.c.bf16 %v1236_v20, %v1235_v19  ;;  %v1256_v17 = vld [vmem:[%s2902_s1 + $0x1c0] sm:$0xff]  ;;  %v1273_v18 = vld [vmem:[%s2903_s2 + $0x1b8] sm:$0xff] }
  0x2e   :  { %1651 = vmatprep.mubr.msk.f32.mxu1 %vm2168_vm0, %v2169_v8  ;;  %v1274_v19 = vld [vmem:[%s2903_s2 + $0x1c0] sm:$0xff] }
  0x2f   :  { %1935 = vmatpush3.bf16.msra.mxu0 %v1934_v24  ;;  %v1220_v24 = vld [vmem:[%s2902_s1 + $0x148] sm:$0xff] }
  0x30   :  { %1977 = vmatpush3.bf16.msra.mxu1 %v1976_v26  ;;  %1936 = vmatprep.subr.bf16.mxu0 %v2167_v0  ;;  %v1237_v26 = vld [vmem:[%s2903_s2 + $0x140] sm:$0xff]  ;;  %v2003_v28 = vpack.c.bf16 %v1220_v24, %v1219_v23  ;;  %v1258_v23 = vld [vmem:[%s2902_s1 + $0x1d0] sm:$0xff]  ;;  %v1275_v24 = vld [vmem:[%s2903_s2 + $0x1c8] sm:$0xff] }
  0x31   :  { %1978 = vmatprep.subr.bf16.mxu1 %v2167_v0  ;;  %v2024_v30 = vpack.c.bf16 %v1238_v27, %v1237_v26  ;;  %v1276_v26 = vld [vmem:[%s2903_s2 + $0x1d0] sm:$0xff] }
  0x33   :  { %1938 = vmatpush3.bf16.msra.mxu0 %v1937_v32  ;;  %v1222_v32 = vld [vmem:[%s2902_s1 + $0x158] sm:$0xff] }
  0x34   :  { %1980 = vmatpush3.bf16.msra.mxu1 %v1979_v33  ;;  %1939 = vmatprep.subr.bf16.mxu0 %v2167_v0  ;;  %v1239_v33 = vld [vmem:[%s2903_s2 + $0x150] sm:$0xff]  ;;  %v2006_v36 = vpack.c.bf16 %v1222_v32, %v1221_v31  ;;  %v1282_v31 = vld [vmem:[%s2902_s1 + $0x1e8] sm:$0xff]  ;;  %v1259_v32 = vld [vmem:[%s2902_s1 + $0x1d8] sm:$0xff] }
  0x35   :  { %1981 = vmatprep.subr.bf16.mxu1 %v2167_v0  ;;  %v2027_v37 = vpack.c.bf16 %v1240_v34, %v1239_v33  ;;  %v1299_v33 = vld [vmem:[%s2903_s2 + $0x1e0] sm:$0xff]  ;;  %v1300_v34 = vld [vmem:[%s2903_s2 + $0x1e8] sm:$0xff] }
  0x37   :  { %1941 = vmatpush3.bf16.msra.mxu0 %v1940_v39  ;;  %v445_v39 = vrot.slane %v2273_v29, 2 }
  0x38   :  { %1983 = vmatpush3.bf16.msra.mxu1 %v1982_v40  ;;  %1942 = vmatprep.subr.bf16.mxu0 %v2167_v0  ;;  %v1245_v40 = vld [vmem:[%s2902_s1 + $0x168] sm:$0xff] }
  0x39   :  { %1984 = vmatprep.subr.bf16.mxu1 %v2167_v0  ;;  %v446_v46 = vsel %vm443_vm5, %v444_v38, %v445_v39  ;;  %v2093_v38 = vpack.c.bf16 %v1300_v34, %v1299_v33 }
  0x3b   :  { %1944 = vmatpush3.bf16.msra.mxu0 %v1943_v47  ;;  %v2030_v47 = vpack.c.bf16 %v1246_v42, %v1245_v40  ;;  %v1284_v40 = vld [vmem:[%s2902_s1 + $0x1f8] sm:$0xff]  ;;  %v1301_v42 = vld [vmem:[%s2903_s2 + $0x1f0] sm:$0xff] }
  0x3c   :  { %1986 = vmatpush3.bf16.msra.mxu1 %v1985_v48  ;;  %1571 = vmatprep.subr.mxu0 %v2169_v8  ;;  %v447_v48 = vrot.slane %v2304_v41, 2 }
  0x3d   :  { %1649 = vmatprep.subr.mxu1 %v2169_v8 }
  0x3f   :  { %1572 = vmatpush3.msra.mxu0 %v37_v52  ;;  %v1248_v52 = vld [vmem:[%s2902_s1 + $0x180] sm:$0xff] }
  0x40   :  { %1650 = vmatpush3.msra.mxu1 %v52_v55  ;;  %1987 = vmatprep.subr.bf16.mxu0 %v2167_v0  ;;  %v2033_v54 = vpack.c.bf16 %v1248_v52, %v1247_v51  ;;  %v448_v55 = vsel %vm443_vm5, %v445_v39, %v447_v48  ;;  %v1283_v39 = vld [vmem:[%s2902_s1 + $0x1f0] sm:$0xff]  ;;  %v1288_v52 = vld [vmem:[%s2902_s1 + $0x218] sm:$0xff] }
  0x41   :  { %2008 = vmatprep.subr.bf16.mxu1 %v2167_v0  ;;  %1574 = vmatmul.mubr.msk.f32.vlgmr.msra.gmra.mrb[0].mxu0 %vm78_vm4, %v2261_v25  ;;  %v1287_v51 = vld [vmem:[%s2902_s1 + $0x210] sm:$0xff] }
  0x42   :  { %1652 = vmatmul.mubr.msk.f32.vlgmr.msra.gmra.mrb[0].mxu1 %vm78_vm4, %v2261_v25  ;;  %1989 = vmatpush3.bf16.msra.mxu0 %v1988_v56  ;;  %v1263_v25 = vld [vmem:[%s2903_s2 + $0x168] sm:$0xff] }
  0x43   :  { %2010 = vmatpush3.bf16.msra.mxu1 %v2009_v57  ;;  %1990 = vmatprep.subr.bf16.mxu0 %v2167_v0  ;;  %v1249_v57 = vld [vmem:[%s2902_s1 + $0x188] sm:$0xff] }
  0x44   :  { %2011 = vmatprep.subr.bf16.mxu1 %v2167_v0  ;;  %1576 = vmatprep.mubr.msk.f32.mxu0 %vm2168_vm0, %v2169_v8  ;;  %v2036_v62 = vpack.c.bf16 %v1250_v58, %v1249_v57  ;;  %v1307_v57 = vld [vmem:[%s2903_s2 + $0x220] sm:$0xff] }
  0x45   :  { %1654 = vmatprep.mubr.msk.f32.mxu1 %vm2168_vm0, %v2169_v8  ;;  %1577 = vmatmul.mubr.msk.f32.gmra.mrb[2].mxu0 %vm78_vm4, %v2273_v29 }
  0x46   :  { %1992 = vmatpush3.bf16.msra.mxu0 %v1991_v63  ;;  %1655 = vmatmul.mubr.msk.f32.gmra.mrb[2].mxu1 %vm78_vm4, %v2273_v29  ;;  %v1264_v29 = vld [vmem:[%s2903_s2 + $0x170] sm:$0xff]  ;;  %v2057_v63 = vpack.c.bf16 %v1268_v60, %v1267_v59 }
  0x47   :  { %2013 = vmatpush3.bf16.msra.mxu1 %v2012_v1  ;;  %1993 = vmatprep.subr.bf16.mxu0 %v2167_v0  ;;  %v2051_v50 = vpack.c.bf16 %v1264_v29, %v1263_v25  ;;  %v1251_v1 = vld [vmem:[%s2902_s1 + $0x198] sm:$0xff]  ;;  %v2075_v25 = vpack.c.bf16 %v1284_v40, %v1283_v39  ;;  %v1291_v60 = vld [vmem:[%s2902_s1 + $0x230] sm:$0xff]  ;;  %v1317_v39 = vld [vmem:[%s2906_s3] ss:$0 sm:$0xff] }
  0x48   :  { %2014 = vmatprep.subr.bf16.mxu1 %v2167_v0  ;;  %1579 = vmatprep.mubr.msk.f32.mxu0 %vm2168_vm0, %v2169_v8  ;;  %v2039_v6 = vpack.c.bf16 %v1252_v2, %v1251_v1  ;;  %v1310_v1 = vld [vmem:[%s2903_s2 + $0x238] sm:$0xff] }
  0x49   :  { %1657 = vmatprep.mubr.msk.f32.mxu1 %vm2168_vm0, %v2169_v8  ;;  %1580 = vmatmul.mubr.msk.f32.gmra.mrb[4].mxu0 %vm78_vm4, %v2304_v41 }
  0x4a   :  { %1995 = vmatpush3.bf16.msra.mxu0 %v1994_v7  ;;  %1658 = vmatmul.mubr.msk.f32.gmra.mrb[4].mxu1 %vm78_vm4, %v2304_v41  ;;  %v1266_v41 = vld [vmem:[%s2903_s2 + $0x180] sm:$0xff]  ;;  %v2060_v7 = vpack.c.bf16 %v1270_v5, %v1269_v4 }
  0x4b   :  { %2016 = vmatpush3.bf16.msra.mxu1 %v2015_v9  ;;  %1996 = vmatprep.subr.bf16.mxu0 %v2167_v0  ;;  %v2054_v56 = vpack.c.bf16 %v1266_v41, %v1265_v53  ;;  %v1253_v9 = vld [vmem:[%s2902_s1 + $0x1a8] sm:$0xff]  ;;  %v1305_v53 = vld [vmem:[%s2903_s2 + $0x210] sm:$0xff]  ;;  %v2081_v41 = vpack.c.bf16 %v1288_v52, %v1287_v51  ;;  %v1293_v5 = vld [vmem:[%s2902_s1 + $0x240] sm:$0xff] }
  0x4c   :  { %2017 = vmatprep.subr.bf16.mxu1 %v2167_v0  ;;  %1690 = vmatprep.mubr.msk.f32.mxu0 %vm2168_vm0, %v2169_v8  ;;  %v2042_v14 = vpack.c.bf16 %v1254_v11, %v1253_v9  ;;  %v1312_v9 = vld [vmem:[%s2903_s2 + $0x248] sm:$0xff] }
  0x4d   :  { %1729 = vmatprep.mubr.msk.f32.mxu1 %vm2168_vm0, %v2169_v8 }
  0x4e   :  { %1998 = vmatpush3.bf16.msra.mxu0 %v1997_v15  ;;  %v2063_v15 = vpack.c.bf16 %v1272_v13, %v1271_v12  ;;  %v1295_v13 = vld [vmem:[%s2902_s1 + $0x250] sm:$0xff] }
  0x4f   :  { %2019 = vmatpush3.bf16.msra.mxu1 %v2018_v16  ;;  %1999 = vmatprep.subr.bf16.mxu0 %v2167_v0  ;;  %v1255_v16 = vld [vmem:[%s2902_s1 + $0x1b8] sm:$0xff] }
  0x50   :  { %2020 = vmatprep.subr.bf16.mxu1 %v2167_v0  ;;  %v2045_v20 = vpack.c.bf16 %v1256_v17, %v1255_v16 }
  0x52   :  { %2001 = vmatpush3.bf16.msra.mxu0 %v2000_v21  ;;  %v2066_v21 = vpack.c.bf16 %v1274_v19, %v1273_v18 }
  0x53   :  { %2022 = vmatpush3.bf16.msra.mxu1 %v2021_v22  ;;  %2002 = vmatprep.subr.bf16.mxu0 %v2167_v0  ;;  %v1257_v22 = vld [vmem:[%s2902_s1 + $0x1c8] sm:$0xff] }
  0x54   :  { %2023 = vmatprep.subr.bf16.mxu1 %v2167_v0  ;;  %v2048_v27 = vpack.c.bf16 %v1258_v23, %v1257_v22 }
  0x56   :  { %2004 = vmatpush3.bf16.msra.mxu0 %v2003_v28  ;;  %v2069_v28 = vpack.c.bf16 %v1276_v26, %v1275_v24 }
  0x57   :  { %2025 = vmatpush3.bf16.msra.mxu1 %v2024_v30  ;;  %2005 = vmatprep.subr.bf16.mxu0 %v2167_v0  ;;  %v1281_v30 = vld [vmem:[%s2902_s1 + $0x1e0] sm:$0xff] }
  0x58   :  { %2026 = vmatprep.subr.bf16.mxu1 %v2167_v0 }
  0x5a   :  { %2007 = vmatpush3.bf16.msra.mxu0 %v2006_v36  ;;  %v1277_v36 = vld [vmem:[%s2903_s2 + $0x1d8] sm:$0xff] }
  0x5b   :  { %2028 = vmatpush3.bf16.msra.mxu1 %v2027_v37  ;;  %1688 = vmatprep.subr.mxu0 %v2169_v8  ;;  %v2072_v37 = vpack.c.bf16 %v1282_v31, %v1281_v30 }
  0x5c   :  { %1727 = vmatprep.subr.mxu1 %v2169_v8 }
  0x5e   :  { %1689 = vmatpush3.msra.mxu0 %v1223_v44  ;;  %v1302_v44 = vld [vmem:[%s2903_s2 + $0x1f8] sm:$0xff] }
  0x5f   :  { %1728 = vmatpush3.msra.mxu1 %v1241_v45  ;;  %2029 = vmatprep.subr.bf16.mxu0 %v2167_v0  ;;  %v2096_v29 = vpack.c.bf16 %v1302_v44, %v1301_v42  ;;  %v1285_v45 = vld [vmem:[%s2902_s1 + $0x200] sm:$0xff] }
  0x60   :  { %2050 = vmatprep.subr.bf16.mxu1 %v2167_v0  ;;  %1691 = vmatmul.mubr.msk.f32.vlgmr.msra.gmra.mrb[0].mxu0 %vm78_vm4, %v446_v46 }
  0x61   :  { %1730 = vmatmul.mubr.msk.f32.vlgmr.msra.gmra.mrb[0].mxu1 %vm78_vm4, %v446_v46  ;;  %2031 = vmatpush3.bf16.msra.mxu0 %v2030_v47  ;;  %v1286_v46 = vld [vmem:[%s2902_s1 + $0x208] sm:$0xff] }
  0x62   :  { %2052 = vmatpush3.bf16.msra.mxu1 %v2051_v50  ;;  %2032 = vmatprep.subr.bf16.mxu0 %v2167_v0  ;;  %v1304_v47 = vld [vmem:[%s2903_s2 + $0x208] sm:$0xff] }
  0x63   :  { %2053 = vmatprep.subr.bf16.mxu1 %v2167_v0  ;;  %1693 = vmatprep.mubr.msk.f32.mxu0 %vm2168_vm0, %v2169_v8 }
  0x64   :  { %1732 = vmatprep.mubr.msk.f32.mxu1 %vm2168_vm0, %v2169_v8  ;;  %1694 = vmatmul.mubr.msk.f32.gmra.mrb[2].mxu0 %vm78_vm4, %v448_v55 }
  0x65   :  { %2034 = vmatpush3.bf16.msra.mxu0 %v2033_v54  ;;  %1733 = vmatmul.mubr.msk.f32.gmra.mrb[2].mxu1 %vm78_vm4, %v448_v55  ;;  %v1289_v55 = vld [vmem:[%s2902_s1 + $0x220] sm:$0xff] }
  0x66   :  { %2055 = vmatpush3.bf16.msra.mxu1 %v2054_v56  ;;  %2035 = vmatprep.subr.bf16.mxu0 %v2167_v0  ;;  %v1290_v56 = vld [vmem:[%s2902_s1 + $0x228] sm:$0xff] }
  0x67   :  { %2056 = vmatprep.subr.bf16.mxu1 %v2167_v0  ;;  %1696 = vmatprep.mubr.msk.f32.mxu0 %vm2168_vm0, %v2169_v8  ;;  %v2084_v58 = vpack.c.bf16 %v1290_v56, %v1289_v55 }
  0x68   :  { %1735 = vmatprep.mubr.msk.f32.mxu1 %vm2168_vm0, %v2169_v8  ;;  %1697 = vmatmul.mubr.msk.f32.gmra.mrb[4].mxu0 %vm78_vm4, %v447_v48 }
  0x69   :  { %2037 = vmatpush3.bf16.msra.mxu0 %v2036_v62  ;;  %1736 = vmatmul.mubr.msk.f32.gmra.mrb[4].mxu1 %vm78_vm4, %v447_v48  ;;  %v2078_v48 = vpack.c.bf16 %v1286_v46, %v1285_v45  ;;  %v1292_v62 = vld [vmem:[%s2902_s1 + $0x238] sm:$0xff] }
  0x6a   :  { %2058 = vmatpush3.bf16.msra.mxu1 %v2057_v63  ;;  %2038 = vmatprep.subr.bf16.mxu0 %v2167_v0  ;;  %v1309_v63 = vld [vmem:[%s2903_s2 + $0x230] sm:$0xff]  ;;  %v2087_v2 = vpack.c.bf16 %v1292_v62, %v1291_v60 }
  0x6b   :  { %2059 = vmatprep.subr.bf16.mxu1 %v2167_v0  ;;  %1768 = vmatprep.mubr.msk.f32.mxu0 %vm2168_vm0, %v2169_v8  ;;  %v2108_v4 = vpack.c.bf16 %v1310_v1, %v1309_v63 }
  0x6c   :  { %1807 = vmatprep.mubr.msk.f32.mxu1 %vm2168_vm0, %v2169_v8 }
  0x6d   :  { %2040 = vmatpush3.bf16.msra.mxu0 %v2039_v6  ;;  %v1294_v6 = vld [vmem:[%s2902_s1 + $0x248] sm:$0xff] }
  0x6e   :  { %2061 = vmatpush3.bf16.msra.mxu1 %v2060_v7  ;;  %2041 = vmatprep.subr.bf16.mxu0 %v2167_v0  ;;  %v1311_v7 = vld [vmem:[%s2903_s2 + $0x240] sm:$0xff]  ;;  %v2090_v11 = vpack.c.bf16 %v1294_v6, %v1293_v5 }
  0x6f   :  { %2062 = vmatprep.subr.bf16.mxu1 %v2167_v0  ;;  %v2111_v12 = vpack.c.bf16 %v1312_v9, %v1311_v7 }
  0x71   :  { %2043 = vmatpush3.bf16.msra.mxu0 %v2042_v14  ;;  %v1313_v14 = vld [vmem:[%s2903_s2 + $0x250] sm:$0xff] }
  0x72   :  { %2064 = vmatpush3.bf16.msra.mxu1 %v2063_v15  ;;  %2044 = vmatprep.subr.bf16.mxu0 %v2167_v0 }
  0x73   :  { %2065 = vmatprep.subr.bf16.mxu1 %v2167_v0 }
  0x75   :  { %2046 = vmatpush3.bf16.msra.mxu0 %v2045_v20 }
  0x76   :  { %2067 = vmatpush3.bf16.msra.mxu1 %v2066_v21  ;;  %2047 = vmatprep.subr.bf16.mxu0 %v2167_v0 }
  0x77   :  { %2068 = vmatprep.subr.bf16.mxu1 %v2167_v0 }
  0x79   :  { %2049 = vmatpush3.bf16.msra.mxu0 %v2048_v27 }
  0x7a   :  { %2070 = vmatpush3.bf16.msra.mxu1 %v2069_v28  ;;  %1766 = vmatprep.subr.mxu0 %v2169_v8 }
  0x7b   :  { %1805 = vmatprep.subr.mxu1 %v2169_v8 }
  0x7d   :  { %1767 = vmatpush3.msra.mxu0 %v1259_v32 }
  0x7e   :  { %1806 = vmatpush3.msra.mxu1 %v1277_v36  ;;  %2071 = vmatprep.subr.bf16.mxu0 %v2167_v0 }
  0x7f   :  { %2092 = vmatprep.subr.bf16.mxu1 %v2167_v0  ;;  %1769 = vmatmul.mubr.msk.f32.vlgmr.msra.gmra.mrb[0].mxu0 %vm78_vm4, %v2285_v35 }
  0x80   :  { %1808 = vmatmul.mubr.msk.f32.vlgmr.msra.gmra.mrb[0].mxu1 %vm78_vm4, %v2285_v35  ;;  %2073 = vmatpush3.bf16.msra.mxu0 %v2072_v37  ;;  %v1303_v35 = vld [vmem:[%s2903_s2 + $0x200] sm:$0xff] }
  0x81   :  { %2094 = vmatpush3.bf16.msra.mxu1 %v2093_v38  ;;  %2074 = vmatprep.subr.bf16.mxu0 %v2167_v0  ;;  %v2099_v50 = vpack.c.bf16 %v1304_v47, %v1303_v35  ;;  %v1074_v38 = vld [vmem:[%s2905_s4] sm:$0xff] }
  0x82   :  { %2095 = vmatprep.subr.bf16.mxu1 %v2167_v0  ;;  %1771 = vmatprep.mubr.msk.f32.mxu0 %vm2168_vm0, %v2169_v8 }
  0x83   :  { %1810 = vmatprep.mubr.msk.f32.mxu1 %vm2168_vm0, %v2169_v8  ;;  %1772 = vmatmul.mubr.msk.f32.gmra.mrb[2].mxu0 %vm78_vm4, %v2325_v49 }
  0x84   :  { %2076 = vmatpush3.bf16.msra.mxu0 %v2075_v25  ;;  %1811 = vmatmul.mubr.msk.f32.gmra.mrb[2].mxu1 %vm78_vm4, %v2325_v49  ;;  %v1306_v49 = vld [vmem:[%s2903_s2 + $0x218] sm:$0xff] }
  0x85   :  { %2097 = vmatpush3.bf16.msra.mxu1 %v2096_v29  ;;  %2077 = vmatprep.subr.bf16.mxu0 %v2167_v0  ;;  %v2102_v54 = vpack.c.bf16 %v1306_v49, %v1305_v53 }
  0x86   :  { %2098 = vmatprep.subr.bf16.mxu1 %v2167_v0  ;;  %1774 = vmatprep.mubr.msk.f32.mxu0 %vm2168_vm0, %v2169_v8 }
  0x87   :  { %1813 = vmatprep.mubr.msk.f32.mxu1 %vm2168_vm0, %v2169_v8  ;;  %1775 = vmatmul.mubr.msk.f32.gmra.mrb[4].mxu0 %vm78_vm4, %v2307_v43 }
  0x88   :  { %2079 = vmatpush3.bf16.msra.mxu0 %v2078_v48  ;;  %1814 = vmatmul.mubr.msk.f32.gmra.mrb[4].mxu1 %vm78_vm4, %v2307_v43  ;;  %v1308_v43 = vld [vmem:[%s2903_s2 + $0x228] sm:$0xff] }
  0x89   :  { %2100 = vmatpush3.bf16.msra.mxu1 %v2099_v50  ;;  %2080 = vmatprep.subr.bf16.mxu0 %v2167_v0  ;;  %v2105_v59 = vpack.c.bf16 %v1308_v43, %v1307_v57 }
  0x8a   :  { %2101 = vmatprep.subr.bf16.mxu1 %v2167_v0  ;;  %1846 = vmatprep.mubr.msk.f32.mxu0 %vm2168_vm0, %v2169_v8 }
  0x8b   :  { %1885 = vmatprep.mubr.msk.f32.mxu1 %vm2168_vm0, %v2169_v8 }
  0x8c   :  { %2082 = vmatpush3.bf16.msra.mxu0 %v2081_v41 }
  0x8d   :  { %2103 = vmatpush3.bf16.msra.mxu1 %v2102_v54  ;;  %2083 = vmatprep.subr.bf16.mxu0 %v2167_v0 }
  0x8e   :  { %2104 = vmatprep.subr.bf16.mxu1 %v2167_v0 }
  0x90   :  { %2085 = vmatpush3.bf16.msra.mxu0 %v2084_v58 }
  0x91   :  { %2106 = vmatpush3.bf16.msra.mxu1 %v2105_v59  ;;  %2086 = vmatprep.subr.bf16.mxu0 %v2167_v0 }
  0x92   :  { %2107 = vmatprep.subr.bf16.mxu1 %v2167_v0 }
  0x94   :  { %2088 = vmatpush3.bf16.msra.mxu0 %v2087_v2 }
  0x95   :  { %2109 = vmatpush3.bf16.msra.mxu1 %v2108_v4  ;;  %2089 = vmatprep.subr.bf16.mxu0 %v2167_v0 }
  0x96   :  { %2110 = vmatprep.subr.bf16.mxu1 %v2167_v0 }
  0x98   :  { %2091 = vmatpush3.bf16.msra.mxu0 %v2090_v11 }
  0x99   :  { %2112 = vmatpush3.bf16.msra.mxu1 %v2111_v12  ;;  %1844 = vmatprep.subr.mxu0 %v2169_v8 }
  0x9a   :  { %1883 = vmatprep.subr.mxu1 %v2169_v8 }
  0x9c   :  { %1845 = vmatpush3.msra.mxu0 %v1295_v13 }
  0x9d   :  { %1884 = vmatpush3.msra.mxu1 %v1313_v14  ;;  %1847 = vmatmul.mubr.msk.f32.vlgmr.msra.gmra.mrb[0].mxu0 %vm78_vm4, %v2350_v61 }
  0x9e   :  { %1886 = vmatmul.mubr.msk.f32.vlgmr.msra.gmra.mrb[0].mxu1 %vm78_vm4, %v2350_v61  ;;  %1849 = vmatprep.mubr.msk.f32.mxu0 %vm2168_vm0, %v2169_v8 }
  0x9f   :  { %1888 = vmatprep.mubr.msk.f32.mxu1 %vm2168_vm0, %v2169_v8  ;;  %2113 = vmatprep.subr.bf16.mxu0 %v2167_v0 }
  0xa1   :  { %1850 = vmatmul.mubr.msk.f32.gmra.mrb[2].mxu0 %vm78_vm4, %v2376_v10 }
  0xa2   :  { %1889 = vmatmul.mubr.msk.f32.gmra.mrb[2].mxu1 %vm78_vm4, %v2376_v10  ;;  %1852 = vmatprep.mubr.msk.f32.mxu0 %vm2168_vm0, %v2169_v8 }
  0xa3   :  { %1891 = vmatprep.mubr.msk.f32.mxu1 %vm2168_vm0, %v2169_v8 }
  0xa5   :  { %1853 = vmatmul.mubr.msk.f32.gmra.mrb[4].mxu0 %vm78_vm4, %v2359_v3 }
  0xa6   :  { %1892 = vmatmul.mubr.msk.f32.gmra.mrb[4].mxu1 %vm78_vm4, %v2359_v3  ;;  %1900 = vmatprep.mubr.msk.f32.mxu0 %vm2168_vm0, %v2169_v8 }
 0x170   :  { %v941_v0 = vpop.f32.mrb[0].mxu0 }
 0x171   :  { %v1040_v61 = vpop.f32.mrb[0].mxu1  ;;  %v1848_v15 = vpop.f32.mrb[1].mxu0 }
 0x172   :  { %v1057_v16 = vmax.f32 %v941_v0, %v1040_v61  ;;  %v1887_v10 = vpop.f32.mrb[1].mxu1 }
 0x174   :  { %v946_v17 = vpop.f32.mrb[2].mxu0  ;;  %v1063_v22 = vrot.slane %v1057_v16, 1 }
 0x175   :  { %v1045_v18 = vpop.f32.mrb[2].mxu1  ;;  %v1851_v19 = vpop.f32.mrb[3].mxu0 }
 0x176   :  { %v1058_v20 = vmax.f32 %v946_v17, %v1045_v18  ;;  %v1890_v21 = vpop.f32.mrb[3].mxu1 }
 0x178   :  { %v1064_v23 = vrot.slane %v1058_v20, 1  ;;  %v951_v24 = vpop.f32.mrb[4].mxu0 }
 0x179   :  { %v1050_v26 = vpop.f32.mrb[4].mxu1  ;;  %v1854_v27 = vpop.f32.mrb[5].mxu0 }
 0x17a   :  { %v1065_v3 = vsel %vm72_vm2, %v1063_v22, %v1064_v23  ;;  %v1059_v28 = vmax.f32 %v951_v24, %v1050_v26  ;;  %v1893_v30 = vpop.f32.mrb[5].mxu1 }
 0x17b   :  { %v1071_v31 = vmax.f32 %v1057_v16, %v1065_v3 }
 0x17c   :  { %v1066_v32 = vrot.slane %v1059_v28, 1 }
 0x17e   :  { %v1067_v33 = vsel %vm72_vm2, %v1064_v23, %v1066_v32  ;;  %v1073_v37 = vmax.f32 %v1059_v28, %v1066_v32 }
 0x17f   :  { %v1072_v34 = vmax.f32 %v1058_v20, %v1067_v33 }
 0x181   :  { %v2114_v36 = vpack.c.bf16 %v1072_v34, %v1071_v31 }
 0x183   :  { %2115 = vmatpush3.bf16.msra.mxu0 %v2114_v36 }
 0x184   :  { %1898 = vmatprep.subr.mxu0 %v2169_v8 }
 0x187   :  { %1899 = vmatpush3.msk.msra.mxu0 %vm1086_vm6, %v1073_v37 }
 0x188   :  { %1901 = vmatmul.mubr.msk.f32.vlgmr.msra.gmra.mrb[6].mxu0 %vm1082_vm7, %v1074_v38 }
 0x25b   :  { %v1156_v40 = vpop.f32.mrb[6].mxu0 }
 0x25c   :  { %v1157_v42 = vadd.f32 %v1317_v39, %v1156_v40  ;;  %v1902_v44 = vpop.f32.mrb[7].mxu0 }
 0x25e   :  { %v1160_v25 = vmax.f32 %v1157_v42, 0.0 }
 0x260   :  { %1162 = vst.msk [vmem:[%s2907_s5] sm:$0xff] %vm1161_vm8, %v1160_v25 }

// kernel: net_forward.3
= control target key start
LH: loop header
LB: loop body
LE: loop exit
PB: predicated region body
PF: predicated region fallthrough
CT: control target
= control target key end

     0   :  { %10 = vsyncpa [#allocation3], 0  ;;  %s2757_s0 = inlined_call_operand.vmem [shape: f32[56,28], index: 0, kind: input, shape index: {}]   ;;  %s2758_s1 = inlined_call_operand.hbm [shape: f32[5,28,120], index: 1, kind: input, shape index: {}]   ;;  %s2759_s2 = inlined_call_operand.hbm [shape: f32[5,28,120], index: 2, kind: input, shape index: {}]   ;;  %s2760_s3 = inlined_call_operand.vmem [shape: f32[1,120], index: 3, kind: input, shape index: {}]   ;;  %s2761_s4 = inlined_call_operand.vmem [shape: f32[24,51], index: 4, kind: input, shape index: {}]   ;;  %s2762_s5 = inlined_call_operand.vmem [shape: f32[24,120], index: 5, kind: output, shape index: {}]  }
   0x1   :  { %11 = vsyncpa [#allocation5], 0  ;;  %s2240_s18 = smov [#allocation2]   ;;  %s2192_s22 = scalar_lea.hbm %s2758_s1, 2560 }
   0x2   :  { %s19_s19 = sshll.u32 %s2240_s18, 4  ;;  %p2193_p0 = scmp.ne.s32.totalorder %s2758_s1, %s2192_s22  ;;  %s20_s19 = int_to_ptr.vmem [resolvable:$true] %s19_s19 }
   0x3   :  { %p2196_p1 = scmp.lt.u32.totalorder %s2192_s22, %s2758_s1 }
   0x5   :  { %p2198_p2 = pnand %p2196_p1, %p2193_p0 }
   0x7   :  { %2201 = shalt.err (!%p2198_p2)
}
   0x8   :  { %s2202_s27 = scalar_lea.vmem %s20_s19, 2560  ;;  %p2207_p4 = scmp.lt.s32.totalorder %s20_s19, %s20_s19 }
   0x9   :  { %p2203_p3 = scmp.ne.s32.totalorder %s20_s19, %s2202_s27  ;;  %p2208_p5 = scmp.lt.s32.totalorder %s2202_s27, %s2202_s27 }
   0xb   :  { %p2209_p6 = por %p2208_p5, %p2207_p4 }
   0xd   :  { %p2210_p7 = pnand %p2209_p6, %p2203_p3 }
   0xf   :  { %2213 = shalt.err (!%p2210_p7)
}
  0x10   :  { %s2241_s28 = smov 128   ;;  %s2242_s29 = smov 8  }
  0x11   :  { %25 = dma.hbm_to_vmem [thread:$0]  %s2758_s1, 2560, %s20_s19, [#allocation3], %s2241_s28, %s2241_s28, %s2242_s29  }
  0x12   :  { %s2243_s7 = smov [#allocation4]   ;;  %s2214_s11 = scalar_lea.hbm %s2759_s2, 2560 }
  0x13   :  { %s31_s8 = sshll.u32 %s2243_s7, 4  ;;  %p2215_p8 = scmp.ne.s32.totalorder %s2759_s2, %s2214_s11  ;;  %s32_s8 = int_to_ptr.vmem [resolvable:$true] %s31_s8 }
  0x14   :  { %p2218_p9 = scmp.lt.u32.totalorder %s2214_s11, %s2759_s2 }
  0x16   :  { %p2220_p10 = pnand %p2218_p9, %p2215_p8 }
  0x18   :  { %2223 = shalt.err (!%p2220_p10)
}
  0x19   :  { %s2224_s16 = scalar_lea.vmem %s32_s8, 2560  ;;  %p2229_p12 = scmp.lt.s32.totalorder %s32_s8, %s32_s8 }
  0x1a   :  { %p2225_p11 = scmp.ne.s32.totalorder %s32_s8, %s2224_s16  ;;  %p2230_p13 = scmp.lt.s32.totalorder %s2224_s16, %s2224_s16 }
  0x1c   :  { %p2231_p0 = por %p2230_p13, %p2229_p12 }
  0x1e   :  { %p2232_p1 = pnand %p2231_p0, %p2225_p11 }
  0x20   :  { %2235 = shalt.err (!%p2232_p1)
}
  0x21   :  { %37 = dma.hbm_to_vmem [thread:$0]  %s2759_s2, 2560, %s32_s8, [#allocation5], %s2241_s28, %s2241_s28, %s2242_s29  }
  0x22   :  { %2236 = dma.done.wait [#allocation3], 2560  }
  0x23   :  { %2237 = vsyncadd [#allocation3], 4294964736 }
  0x24   :  { %2238 = dma.done.wait [#allocation5], 2560  }
  0x25   :  { %2239 = vsyncadd [#allocation5], 4294964736  ;;  %v2244_v0 = vmov 0.0|0.0   ;;  %vm2245_vm0 = vmmov 0   ;;  %v2246_v1 = vmov 0.0   ;;  %v64_v2 = vld [vmem:[#allocation2 + $0x20] sm:$0xff] }
  0x26   :  { %1985 = vmatprep.subr.bf16.mxu0 %v2244_v0  ;;  %1999 = vmatprep.subr.bf16.mxu1 %v2244_v0  ;;  %v65_v3 = vld [vmem:[#allocation2 + $0x28] sm:$0xff]  ;;  %v326_v4 = vld [vmem:[#allocation4 + $0x20] sm:$0xff]  ;;  %v66_v7 = vld [vmem:[#allocation2 + $0x30] sm:$0xff]  ;;  %vm104_vm1 = vcmask 1043456   ;;  %vm2247_vm2 = vmmov 1   ;;  %vm75_vm4 = vcmask 1046528  }
  0x27   :  { %1680 = vmatprep.mubr.msk.f32.mxu0 %vm2245_vm0, %v2246_v1  ;;  %1738 = vmatprep.mubr.msk.f32.mxu1 %vm2245_vm0, %v2246_v1  ;;  %v1986_v5 = vpack.c.bf16 %v65_v3, %v64_v2  ;;  %v327_v6 = vld [vmem:[#allocation4 + $0x28] sm:$0xff]  ;;  %v67_v8 = vld [vmem:[#allocation2 + $0x38] sm:$0xf]  ;;  %v328_v10 = vld [vmem:[#allocation4 + $0x30] sm:$0xff]  ;;  %vm89_vm5 = vcmask 228352   ;;  %vm799_vm6 = vcmask 1044480  }
  0x28   :  { %v2000_v9 = vpack.c.bf16 %v327_v6, %v326_v4  ;;  %v329_v11 = vld [vmem:[#allocation4 + $0x38] sm:$0xf]  ;;  %v2311_v12 = vld [vmem:[%s2757_s0] sm:$0xff]  ;;  %v1989_v13 = vpack.c.bf16 %v67_v8, %v66_v7  ;;  %v2316_v14 = vld [vmem:[%s2757_s0 + $0x8] sm:$0xff]  ;;  %vm541_vm7 = vcmask 1045504   ;;  %vm1370_vm8 = vcmask 1042432  }
  0x29   :  { %1987 = vmatpush3.bf16.msra.mxu0 %v1986_v5  ;;  %v76_v15 = vrot.slane %v2311_v12, 1  ;;  %vm2321_vm3 = vmpackc.low %vm104_vm1, %vm2247_vm2  ;;  %v2003_v17 = vpack.c.bf16 %v329_v11, %v328_v10  ;;  %v77_v18 = vrot.slane %v2316_v14, 1  ;;  %v2329_v19 = vld [vmem:[%s2757_s0 + $0x10] sm:$0xff]  ;;  %v55_v20 = vld [vmem:[#allocation2] sm:$0xff]  ;;  %v800_v33 = vrot.slane %v2311_v12, 3 }
  0x2a   :  { %2001 = vmatpush3.bf16.msra.mxu1 %v2000_v9  ;;  %1988 = vmatprep.subr.bf16.mxu0 %v2244_v0  ;;  %v56_v21 = vld [vmem:[#allocation2 + $0x8] sm:$0xff]  ;;  %v59_v22 = vld [vmem:[#allocation4] sm:$0xff]  ;;  %v79_v25 = vrot.slane %v2329_v19, 1  ;;  %v2341_v26 = vld [vmem:[%s2757_s0 + $0x18] sm:$0xff]  ;;  %v801_v36 = vrot.slane %v2316_v14, 3  ;;  %v803_v39 = vrot.slane %v2329_v19, 3 }
  0x2b   :  { %2002 = vmatprep.subr.bf16.mxu1 %v2244_v0  ;;  %v60_v23 = vld [vmem:[#allocation4 + $0x8] sm:$0xff]  ;;  %v78_v24 = vsel %vm75_vm4, %v76_v15, %v77_v18  ;;  %v1993_v27 = vpack.c.bf16 %v56_v21, %v55_v20  ;;  %v57_v29 = vld [vmem:[#allocation2 + $0x10] sm:$0xff]  ;;  %v58_v30 = vld [vmem:[#allocation2 + $0x18] sm:$0xf]  ;;  %v81_v35 = vrot.slane %v2341_v26, 1  ;;  %v805_v40 = vrot.slane %v2341_v26, 3 }
  0x2c   :  { %v2007_v28 = vpack.c.bf16 %v60_v23, %v59_v22  ;;  %v61_v31 = vld [vmem:[#allocation4 + $0x10] sm:$0xff]  ;;  %v62_v32 = vld [vmem:[#allocation4 + $0x18] sm:$0xf]  ;;  %v80_v34 = vsel %vm75_vm4, %v77_v18, %v79_v25  ;;  %v2358_v37 = vld [vmem:[%s2757_s0 + $0x20] sm:$0xff]  ;;  %v1996_v38 = vpack.c.bf16 %v58_v30, %v57_v29  ;;  %v2377_v45 = vsel %vm799_vm6, %v800_v33, %v801_v36 }
  0x2d   :  { %1991 = vmatpush3.bf16.msk.msra.mxu0 %vm2321_vm3, %v1989_v13  ;;  %v2365_v41 = vld [vmem:[%s2757_s0 + $0x28] sm:$0xff]  ;;  %v2010_v42 = vpack.c.bf16 %v62_v32, %v61_v31  ;;  %v807_v43 = vrot.slane %v2358_v37, 3  ;;  %v2373_v44 = vld [vmem:[%s2757_s0 + $0x30] sm:$0xff]  ;;  %v2380_v46 = vsel %vm799_vm6, %v801_v36, %v803_v39  ;;  %v82_v48 = vsel %vm75_vm4, %v79_v25, %v81_v35  ;;  %v537_v11 = vld [vmem:[#allocation2 + $0x40] sm:$0xff] }
  0x2e   :  { %2005 = vmatpush3.bf16.msk.msra.mxu1 %vm2321_vm3, %v2003_v17  ;;  %1992 = vmatprep.subr.bf16.mxu0 %v2244_v0  ;;  %v809_v47 = vrot.slane %v2365_v41, 3  ;;  %v83_v49 = vrot.slane %v2358_v37, 1  ;;  %v2389_v50 = vsel %vm799_vm6, %v803_v39, %v805_v40  ;;  %v2392_v51 = vrot.slane %v2373_v44, 3  ;;  %v538_v13 = vld [vmem:[#allocation2 + $0x48] sm:$0xff]  ;;  %v680_v15 = vld [vmem:[#allocation4 + $0x40] sm:$0xff]  ;;  %v539_v21 = vld [vmem:[#allocation2 + $0x50] sm:$0xff] }
  0x2f   :  { %2006 = vmatprep.subr.bf16.mxu1 %v2244_v0  ;;  %v2399_v52 = vsel %vm799_vm6, %v805_v40, %v807_v43  ;;  %v1057_v54 = vrot.slane %v2311_v12, 4  ;;  %v1058_v56 = vrot.slane %v2316_v14, 4  ;;  %v1060_v57 = vrot.slane %v2329_v19, 4  ;;  %v681_v17 = vld [vmem:[#allocation4 + $0x48] sm:$0xff]  ;;  %v540_v22 = vld [vmem:[#allocation2 + $0x58] sm:$0xf] }
  0x30   :  { %1681 = vmatmul.mubr.msk.f32.vlgmr.msra.gmra.mrb[0].mxu0 %vm89_vm5, %v78_v24  ;;  %v2402_v53 = vsel %vm799_vm6, %v807_v43, %v809_v47  ;;  %v2410_v55 = vsel %vm799_vm6, %v809_v47, %v2392_v51  ;;  %v1062_v58 = vrot.slane %v2341_v26, 4  ;;  %v1064_v59 = vrot.slane %v2358_v37, 4  ;;  %v682_v23 = vld [vmem:[#allocation4 + $0x50] sm:$0xff]  ;;  %v795_v30 = vld [vmem:[#allocation2 + $0x60] sm:$0xff]  ;;  %v796_v31 = vld [vmem:[#allocation2 + $0x68] sm:$0xff] }
  0x31   :  { %1739 = vmatmul.mubr.msk.f32.vlgmr.msra.gmra.mrb[0].mxu1 %vm89_vm5, %v78_v24  ;;  %1683 = vmatprep.mubr.msk.f32.mxu0 %vm2245_vm0, %v2246_v1  ;;  %v1066_v60 = vrot.slane %v2365_v41, 4  ;;  %v2420_v61 = vrot.slane %v2373_v44, 4  ;;  %v84_v62 = vsel %vm75_vm4, %v81_v35, %v83_v49  ;;  %v85_v63 = vrot.slane %v2365_v41, 1  ;;  %v683_v24 = vld [vmem:[#allocation4 + $0x58] sm:$0xf]  ;;  %v938_v32 = vld [vmem:[#allocation4 + $0x60] sm:$0xff] }
  0x32   :  { %1741 = vmatprep.mubr.msk.f32.mxu1 %vm2245_vm0, %v2246_v1  ;;  %1994 = vmatpush3.bf16.msra.mxu0 %v1993_v27  ;;  %v2428_v2 = vsel %vm104_vm1, %v1057_v54, %v1058_v56  ;;  %v2431_v3 = vsel %vm104_vm1, %v1058_v56, %v1060_v57  ;;  %v2436_v4 = vsel %vm104_vm1, %v1060_v57, %v1062_v58  ;;  %v87_v9 = vrot.slane %v2373_v44, 1  ;;  %v939_v33 = vld [vmem:[#allocation4 + $0x68] sm:$0xff]  ;;  %v797_v36 = vld [vmem:[#allocation2 + $0x70] sm:$0xff]  ;;  %v941_v40 = vld [vmem:[#allocation4 + $0x78] sm:$0xf] }
  0x33   :  { %2008 = vmatpush3.bf16.msra.mxu1 %v2007_v28  ;;  %1995 = vmatprep.subr.bf16.mxu0 %v2244_v0  ;;  %v2439_v5 = vsel %vm104_vm1, %v1062_v58, %v1064_v59  ;;  %v2442_v6 = vsel %vm104_vm1, %v1064_v59, %v1066_v60  ;;  %v2446_v7 = vsel %vm104_vm1, %v1066_v60, %v2420_v61  ;;  %v542_v28 = vrot.slane %v2311_v12, 2  ;;  %v940_v39 = vld [vmem:[#allocation4 + $0x70] sm:$0xff]  ;;  %v1054_v57 = vld [vmem:[#allocation2 + $0x88] sm:$0xff]  ;;  %v1195_v58 = vld [vmem:[#allocation4 + $0x80] sm:$0xff] }
  0x34   :  { %1684 = vmatmul.mubr.msk.f32.gmra.mrb[2].mxu0 %vm89_vm5, %v80_v34  ;;  %2009 = vmatprep.subr.bf16.mxu1 %v2244_v0  ;;  %v86_v8 = vsel %vm75_vm4, %v83_v49, %v85_v63  ;;  %v88_v10 = vsel %vm75_vm4, %v85_v63, %v87_v9  ;;  %v2014_v18 = vpack.c.bf16 %v538_v13, %v537_v11  ;;  %v543_v29 = vrot.slane %v2316_v14, 2  ;;  %v1196_v59 = vld [vmem:[#allocation4 + $0x88] sm:$0xff]  ;;  %v1055_v63 = vld [vmem:[#allocation2 + $0x90] sm:$0xff] }
  0x35   :  { %1742 = vmatmul.mubr.msk.f32.gmra.mrb[2].mxu1 %vm89_vm5, %v80_v34  ;;  %1686 = vmatprep.mubr.msk.f32.mxu0 %vm2245_vm0, %v2246_v1  ;;  %v2021_v20 = vpack.c.bf16 %v681_v17, %v680_v15  ;;  %v2017_v25 = vpack.c.bf16 %v540_v22, %v539_v21  ;;  %v2024_v27 = vpack.c.bf16 %v683_v24, %v682_v23  ;;  %v551_v49 = vrot.slane %v2365_v41, 2 }
  0x36   :  { %1744 = vmatprep.mubr.msk.f32.mxu1 %vm2245_vm0, %v2246_v1  ;;  %1998 = vmatpush3.bf16.msk.msra.mxu0 %vm2321_vm3, %v1996_v38  ;;  %v2028_v34 = vpack.c.bf16 %v796_v31, %v795_v30  ;;  %v2035_v35 = vpack.c.bf16 %v939_v33, %v938_v32  ;;  %v798_v38 = vld [vmem:[#allocation2 + $0x78] sm:$0xf]  ;;  %v2038_v47 = vpack.c.bf16 %v941_v40, %v940_v39  ;;  %v553_v56 = vrot.slane %v2373_v44, 2 }
  0x37   :  { %2012 = vmatpush3.bf16.msk.msra.mxu1 %vm2321_vm3, %v2010_v42  ;;  %2013 = vmatprep.subr.bf16.mxu0 %v2244_v0  ;;  %v2031_v43 = vpack.c.bf16 %v798_v38, %v797_v36  ;;  %vm1360_vm9 = vcmask 416768   ;;  %vm1457_vm10 = vcmask 982016  }
  0x38   :  { %1687 = vmatmul.mubr.msk.f32.gmra.mrb[4].mxu0 %vm89_vm5, %v82_v48  ;;  %2020 = vmatprep.subr.bf16.mxu1 %v2244_v0 }
  0x39   :  { %1745 = vmatmul.mubr.msk.f32.gmra.mrb[4].mxu1 %vm89_vm5, %v82_v48  ;;  %1689 = vmatprep.mubr.msk.f32.mxu0 %vm2245_vm0, %v2246_v1  ;;  %v549_v48 = vrot.slane %v2358_v37, 2 }
  0x3a   :  { %1747 = vmatprep.mubr.msk.f32.mxu1 %vm2245_vm0, %v2246_v1 }
  0x3b   :  { %v552_v54 = vsel %vm541_vm7, %v549_v48, %v551_v49 }
  0x3c   :  { %1690 = vmatmul.mubr.msk.f32.gmra.mrb[6].mxu0 %vm89_vm5, %v84_v62 }
  0x3d   :  { %1748 = vmatmul.mubr.msk.f32.gmra.mrb[6].mxu1 %vm89_vm5, %v84_v62  ;;  %1692 = vmatprep.mubr.msk.f32.mxu0 %vm2245_vm0, %v2246_v1  ;;  %v2049_v62 = vpack.c.bf16 %v1196_v59, %v1195_v58 }
  0x3e   :  { %1750 = vmatprep.mubr.msk.f32.mxu1 %vm2245_vm0, %v2246_v1 }
  0x40   :  { %1693 = vmatmul.mubr.msk.f32.gmra.mrb[8].mxu0 %vm89_vm5, %v86_v8 }
  0x41   :  { %1751 = vmatmul.mubr.msk.f32.gmra.mrb[8].mxu1 %vm89_vm5, %v86_v8  ;;  %1695 = vmatprep.mubr.msk.f32.mxu0 %vm2245_vm0, %v2246_v1  ;;  %v1056_v8 = vld [vmem:[#allocation2 + $0x98] sm:$0xf] }
  0x42   :  { %1753 = vmatprep.mubr.msk.f32.mxu1 %vm2245_vm0, %v2246_v1  ;;  %v2045_v11 = vpack.c.bf16 %v1056_v8, %v1055_v63 }
  0x44   :  { %1696 = vmatmul.mubr.msk.f32.gmra.mrb[10].mxu0 %vm89_vm5, %v88_v10 }
  0x45   :  { %1754 = vmatmul.mubr.msk.f32.gmra.mrb[10].mxu1 %vm89_vm5, %v88_v10  ;;  %1698 = vmatprep.mubr.msk.f32.mxu0 %vm2245_vm0, %v2246_v1  ;;  %v1198_v10 = vld [vmem:[#allocation4 + $0x98] sm:$0xf] }
  0x46   :  { %1756 = vmatprep.mubr.msk.f32.mxu1 %vm2245_vm0, %v2246_v1 }
  0x48   :  { %1699 = vmatmul.mubr.msk.f32.gmra.mrb[12].mxu0 %vm89_vm5, %v87_v9 }
  0x49   :  { %1757 = vmatmul.mubr.msk.f32.gmra.mrb[12].mxu1 %vm89_vm5, %v87_v9  ;;  %1709 = vmatprep.mubr.msk.f32.mxu0 %vm2245_vm0, %v2246_v1  ;;  %v1197_v9 = vld [vmem:[#allocation4 + $0x90] sm:$0xff] }
  0x4a   :  { %1767 = vmatprep.mubr.msk.f32.mxu1 %vm2245_vm0, %v2246_v1  ;;  %v2052_v13 = vpack.c.bf16 %v1198_v10, %v1197_v9  ;;  %v1351_v9 = vld [vmem:[%s2761_s4 + $0x8] sm:$0xff]  ;;  %v1352_v10 = vld [vmem:[%s2761_s4 + $0x10] sm:$0xff] }
  0x4c   :  { %1710 = vmatmul.mubr.msk.f32.vlgmr.msra.gmra.mrb[0].mxu0 %vm89_vm5, %v2311_v12 }
  0x4d   :  { %1768 = vmatmul.mubr.msk.f32.vlgmr.msra.gmra.mrb[0].mxu1 %vm89_vm5, %v2311_v12  ;;  %1712 = vmatprep.mubr.msk.f32.mxu0 %vm2245_vm0, %v2246_v1  ;;  %v544_v12 = vsel %vm541_vm7, %v542_v28, %v543_v29 }
  0x4e   :  { %1770 = vmatprep.mubr.msk.f32.mxu1 %vm2245_vm0, %v2246_v1  ;;  %2015 = vmatpush3.bf16.msra.mxu0 %v2014_v18 }
  0x4f   :  { %2022 = vmatpush3.bf16.msra.mxu1 %v2021_v20  ;;  %2016 = vmatprep.subr.bf16.mxu0 %v2244_v0 }
  0x50   :  { %1713 = vmatmul.mubr.msk.f32.gmra.mrb[2].mxu0 %vm89_vm5, %v2316_v14  ;;  %2023 = vmatprep.subr.bf16.mxu1 %v2244_v0 }
  0x51   :  { %1771 = vmatmul.mubr.msk.f32.gmra.mrb[2].mxu1 %vm89_vm5, %v2316_v14  ;;  %1715 = vmatprep.mubr.msk.f32.mxu0 %vm2245_vm0, %v2246_v1  ;;  %v545_v14 = vrot.slane %v2329_v19, 2 }
  0x52   :  { %1773 = vmatprep.mubr.msk.f32.mxu1 %vm2245_vm0, %v2246_v1  ;;  %2019 = vmatpush3.bf16.msk.msra.mxu0 %vm2321_vm3, %v2017_v25 }
  0x53   :  { %2026 = vmatpush3.bf16.msk.msra.mxu1 %vm2321_vm3, %v2024_v27  ;;  %2027 = vmatprep.subr.bf16.mxu0 %v2244_v0  ;;  %v546_v42 = vsel %vm541_vm7, %v543_v29, %v545_v14 }
  0x54   :  { %1716 = vmatmul.mubr.msk.f32.gmra.mrb[4].mxu0 %vm89_vm5, %v2329_v19  ;;  %2034 = vmatprep.subr.bf16.mxu1 %v2244_v0 }
  0x55   :  { %1774 = vmatmul.mubr.msk.f32.gmra.mrb[4].mxu1 %vm89_vm5, %v2329_v19  ;;  %1718 = vmatprep.mubr.msk.f32.mxu0 %vm2245_vm0, %v2246_v1  ;;  %v547_v19 = vrot.slane %v2341_v26, 2 }
  0x56   :  { %1776 = vmatprep.mubr.msk.f32.mxu1 %vm2245_vm0, %v2246_v1 }
  0x58   :  { %1719 = vmatmul.mubr.msk.f32.gmra.mrb[6].mxu0 %vm89_vm5, %v2341_v26 }
  0x59   :  { %1777 = vmatmul.mubr.msk.f32.gmra.mrb[6].mxu1 %vm89_vm5, %v2341_v26  ;;  %1721 = vmatprep.mubr.msk.f32.mxu0 %vm2245_vm0, %v2246_v1  ;;  %v548_v26 = vsel %vm541_vm7, %v545_v14, %v547_v19 }
  0x5a   :  { %1779 = vmatprep.mubr.msk.f32.mxu1 %vm2245_vm0, %v2246_v1 }
  0x5c   :  { %1722 = vmatmul.mubr.msk.f32.gmra.mrb[8].mxu0 %vm89_vm5, %v2358_v37 }
  0x5d   :  { %1780 = vmatmul.mubr.msk.f32.gmra.mrb[8].mxu1 %vm89_vm5, %v2358_v37  ;;  %1724 = vmatprep.mubr.msk.f32.mxu0 %vm2245_vm0, %v2246_v1  ;;  %v550_v37 = vsel %vm541_vm7, %v547_v19, %v549_v48 }
  0x5e   :  { %1782 = vmatprep.mubr.msk.f32.mxu1 %vm2245_vm0, %v2246_v1 }
  0x60   :  { %1725 = vmatmul.mubr.msk.f32.gmra.mrb[10].mxu0 %vm89_vm5, %v2365_v41 }
  0x61   :  { %1783 = vmatmul.mubr.msk.f32.gmra.mrb[10].mxu1 %vm89_vm5, %v2365_v41  ;;  %1727 = vmatprep.mubr.msk.f32.mxu0 %vm2245_vm0, %v2246_v1  ;;  %v554_v41 = vsel %vm541_vm7, %v551_v49, %v553_v56 }
  0x62   :  { %1785 = vmatprep.mubr.msk.f32.mxu1 %vm2245_vm0, %v2246_v1 }
  0x64   :  { %1728 = vmatmul.mubr.msk.f32.gmra.mrb[12].mxu0 %vm89_vm5, %v2373_v44 }
  0x65   :  { %1786 = vmatmul.mubr.msk.f32.gmra.mrb[12].mxu1 %vm89_vm5, %v2373_v44  ;;  %1796 = vmatprep.mubr.msk.f32.mxu0 %vm2245_vm0, %v2246_v1  ;;  %v1053_v44 = vld [vmem:[#allocation2 + $0x80] sm:$0xff] }
  0x66   :  { %1825 = vmatprep.mubr.msk.f32.mxu1 %vm2245_vm0, %v2246_v1  ;;  %v2042_v60 = vpack.c.bf16 %v1054_v57, %v1053_v44 }
  0x68   :  { %1797 = vmatmul.mubr.msk.f32.vlgmr.msra.gmra.mrb[0].mxu0 %vm89_vm5, %v544_v12 }
  0x69   :  { %1826 = vmatmul.mubr.msk.f32.vlgmr.msra.gmra.mrb[0].mxu1 %vm89_vm5, %v544_v12  ;;  %1799 = vmatprep.mubr.msk.f32.mxu0 %vm2245_vm0, %v2246_v1 }
  0x6a   :  { %1828 = vmatprep.mubr.msk.f32.mxu1 %vm2245_vm0, %v2246_v1  ;;  %2029 = vmatpush3.bf16.msra.mxu0 %v2028_v34 }
  0x6b   :  { %2036 = vmatpush3.bf16.msra.mxu1 %v2035_v35  ;;  %2030 = vmatprep.subr.bf16.mxu0 %v2244_v0 }
  0x6c   :  { %1800 = vmatmul.mubr.msk.f32.gmra.mrb[2].mxu0 %vm89_vm5, %v546_v42  ;;  %2037 = vmatprep.subr.bf16.mxu1 %v2244_v0 }
  0x6d   :  { %1829 = vmatmul.mubr.msk.f32.gmra.mrb[2].mxu1 %vm89_vm5, %v546_v42  ;;  %1802 = vmatprep.mubr.msk.f32.mxu0 %vm2245_vm0, %v2246_v1 }
  0x6e   :  { %1831 = vmatprep.mubr.msk.f32.mxu1 %vm2245_vm0, %v2246_v1  ;;  %2033 = vmatpush3.bf16.msk.msra.mxu0 %vm2321_vm3, %v2031_v43 }
  0x6f   :  { %2040 = vmatpush3.bf16.msk.msra.mxu1 %vm2321_vm3, %v2038_v47  ;;  %2041 = vmatprep.subr.bf16.mxu0 %v2244_v0 }
  0x70   :  { %1803 = vmatmul.mubr.msk.f32.gmra.mrb[4].mxu0 %vm89_vm5, %v548_v26  ;;  %2048 = vmatprep.subr.bf16.mxu1 %v2244_v0 }
  0x71   :  { %1832 = vmatmul.mubr.msk.f32.gmra.mrb[4].mxu1 %vm89_vm5, %v548_v26  ;;  %1805 = vmatprep.mubr.msk.f32.mxu0 %vm2245_vm0, %v2246_v1 }
  0x72   :  { %1834 = vmatprep.mubr.msk.f32.mxu1 %vm2245_vm0, %v2246_v1 }
  0x74   :  { %1806 = vmatmul.mubr.msk.f32.gmra.mrb[6].mxu0 %vm89_vm5, %v550_v37 }
  0x75   :  { %1835 = vmatmul.mubr.msk.f32.gmra.mrb[6].mxu1 %vm89_vm5, %v550_v37  ;;  %1808 = vmatprep.mubr.msk.f32.mxu0 %vm2245_vm0, %v2246_v1 }
  0x76   :  { %1837 = vmatprep.mubr.msk.f32.mxu1 %vm2245_vm0, %v2246_v1 }
  0x78   :  { %1809 = vmatmul.mubr.msk.f32.gmra.mrb[8].mxu0 %vm89_vm5, %v552_v54 }
  0x79   :  { %1838 = vmatmul.mubr.msk.f32.gmra.mrb[8].mxu1 %vm89_vm5, %v552_v54  ;;  %1811 = vmatprep.mubr.msk.f32.mxu0 %vm2245_vm0, %v2246_v1 }
  0x7a   :  { %1840 = vmatprep.mubr.msk.f32.mxu1 %vm2245_vm0, %v2246_v1 }
  0x7c   :  { %1812 = vmatmul.mubr.msk.f32.gmra.mrb[10].mxu0 %vm89_vm5, %v554_v41 }
  0x7d   :  { %1841 = vmatmul.mubr.msk.f32.gmra.mrb[10].mxu1 %vm89_vm5, %v554_v41  ;;  %1814 = vmatprep.mubr.msk.f32.mxu0 %vm2245_vm0, %v2246_v1 }
  0x7e   :  { %1843 = vmatprep.mubr.msk.f32.mxu1 %vm2245_vm0, %v2246_v1 }
  0x80   :  { %1815 = vmatmul.mubr.msk.f32.gmra.mrb[12].mxu0 %vm89_vm5, %v553_v56 }
  0x81   :  { %1844 = vmatmul.mubr.msk.f32.gmra.mrb[12].mxu1 %vm89_vm5, %v553_v56  ;;  %1854 = vmatprep.mubr.msk.f32.mxu0 %vm2245_vm0, %v2246_v1 }
  0x82   :  { %1883 = vmatprep.mubr.msk.f32.mxu1 %vm2245_vm0, %v2246_v1 }
  0x84   :  { %1855 = vmatmul.mubr.msk.f32.vlgmr.msra.gmra.mrb[0].mxu0 %vm89_vm5, %v2377_v45 }
  0x85   :  { %1884 = vmatmul.mubr.msk.f32.vlgmr.msra.gmra.mrb[0].mxu1 %vm89_vm5, %v2377_v45  ;;  %1857 = vmatprep.mubr.msk.f32.mxu0 %vm2245_vm0, %v2246_v1 }
  0x86   :  { %1886 = vmatprep.mubr.msk.f32.mxu1 %vm2245_vm0, %v2246_v1  ;;  %2043 = vmatpush3.bf16.msra.mxu0 %v2042_v60 }
  0x87   :  { %2050 = vmatpush3.bf16.msra.mxu1 %v2049_v62  ;;  %2044 = vmatprep.subr.bf16.mxu0 %v2244_v0 }
  0x88   :  { %1858 = vmatmul.mubr.msk.f32.gmra.mrb[2].mxu0 %vm89_vm5, %v2380_v46  ;;  %2051 = vmatprep.subr.bf16.mxu1 %v2244_v0 }
  0x89   :  { %1887 = vmatmul.mubr.msk.f32.gmra.mrb[2].mxu1 %vm89_vm5, %v2380_v46  ;;  %1860 = vmatprep.mubr.msk.f32.mxu0 %vm2245_vm0, %v2246_v1 }
  0x8a   :  { %1889 = vmatprep.mubr.msk.f32.mxu1 %vm2245_vm0, %v2246_v1  ;;  %2047 = vmatpush3.bf16.msk.msra.mxu0 %vm2321_vm3, %v2045_v11  ;;  %v1547_v11 = vld [vmem:[%s2760_s3] ss:$0 sm:$0xff] }
  0x8b   :  { %2054 = vmatpush3.bf16.msk.msra.mxu1 %vm2321_vm3, %v2052_v13  ;;  %2055 = vmatprep.subr.bf16.mxu0 %v2244_v0 }
  0x8c   :  { %1861 = vmatmul.mubr.msk.f32.gmra.mrb[4].mxu0 %vm89_vm5, %v2389_v50  ;;  %2064 = vmatprep.subr.bf16.mxu1 %v2244_v0 }
  0x8d   :  { %1890 = vmatmul.mubr.msk.f32.gmra.mrb[4].mxu1 %vm89_vm5, %v2389_v50  ;;  %1863 = vmatprep.mubr.msk.f32.mxu0 %vm2245_vm0, %v2246_v1 }
  0x8e   :  { %1892 = vmatprep.mubr.msk.f32.mxu1 %vm2245_vm0, %v2246_v1 }
  0x90   :  { %1864 = vmatmul.mubr.msk.f32.gmra.mrb[6].mxu0 %vm89_vm5, %v2399_v52 }
  0x91   :  { %1893 = vmatmul.mubr.msk.f32.gmra.mrb[6].mxu1 %vm89_vm5, %v2399_v52  ;;  %1866 = vmatprep.mubr.msk.f32.mxu0 %vm2245_vm0, %v2246_v1 }
  0x92   :  { %1895 = vmatprep.mubr.msk.f32.mxu1 %vm2245_vm0, %v2246_v1 }
  0x94   :  { %1867 = vmatmul.mubr.msk.f32.gmra.mrb[8].mxu0 %vm89_vm5, %v2402_v53 }
  0x95   :  { %1896 = vmatmul.mubr.msk.f32.gmra.mrb[8].mxu1 %vm89_vm5, %v2402_v53  ;;  %1869 = vmatprep.mubr.msk.f32.mxu0 %vm2245_vm0, %v2246_v1 }
  0x96   :  { %1898 = vmatprep.mubr.msk.f32.mxu1 %vm2245_vm0, %v2246_v1 }
  0x98   :  { %1870 = vmatmul.mubr.msk.f32.gmra.mrb[10].mxu0 %vm89_vm5, %v2410_v55 }
  0x99   :  { %1899 = vmatmul.mubr.msk.f32.gmra.mrb[10].mxu1 %vm89_vm5, %v2410_v55  ;;  %1872 = vmatprep.mubr.msk.f32.mxu0 %vm2245_vm0, %v2246_v1 }
  0x9a   :  { %1901 = vmatprep.mubr.msk.f32.mxu1 %vm2245_vm0, %v2246_v1 }
  0x9c   :  { %1873 = vmatmul.mubr.msk.f32.gmra.mrb[12].mxu0 %vm89_vm5, %v2392_v51 }
  0x9d   :  { %1902 = vmatmul.mubr.msk.f32.gmra.mrb[12].mxu1 %vm89_vm5, %v2392_v51  ;;  %1912 = vmatprep.mubr.msk.f32.mxu0 %vm2245_vm0, %v2246_v1 }
  0x9e   :  { %1941 = vmatprep.mubr.msk.f32.mxu1 %vm2245_vm0, %v2246_v1 }
  0xa0   :  { %1913 = vmatmul.mubr.msk.f32.vlgmr.msra.gmra.mrb[0].mxu0 %vm89_vm5, %v2428_v2 }
  0xa1   :  { %1942 = vmatmul.mubr.msk.f32.vlgmr.msra.gmra.mrb[0].mxu1 %vm89_vm5, %v2428_v2  ;;  %1915 = vmatprep.mubr.msk.f32.mxu0 %vm2245_vm0, %v2246_v1 }
  0xa2   :  { %1944 = vmatprep.mubr.msk.f32.mxu1 %vm2245_vm0, %v2246_v1 }
  0xa4   :  { %1916 = vmatmul.mubr.msk.f32.gmra.mrb[2].mxu0 %vm89_vm5, %v2431_v3 }
  0xa5   :  { %1945 = vmatmul.mubr.msk.f32.gmra.mrb[2].mxu1 %vm89_vm5, %v2431_v3  ;;  %1918 = vmatprep.mubr.msk.f32.mxu0 %vm2245_vm0, %v2246_v1 }
  0xa6   :  { %1947 = vmatprep.mubr.msk.f32.mxu1 %vm2245_vm0, %v2246_v1 }
  0xa8   :  { %1919 = vmatmul.mubr.msk.f32.gmra.mrb[4].mxu0 %vm89_vm5, %v2436_v4 }
  0xa9   :  { %1948 = vmatmul.mubr.msk.f32.gmra.mrb[4].mxu1 %vm89_vm5, %v2436_v4  ;;  %1921 = vmatprep.mubr.msk.f32.mxu0 %vm2245_vm0, %v2246_v1 }
  0xaa   :  { %1950 = vmatprep.mubr.msk.f32.mxu1 %vm2245_vm0, %v2246_v1 }
  0xac   :  { %1922 = vmatmul.mubr.msk.f32.gmra.mrb[6].mxu0 %vm89_vm5, %v2439_v5 }
  0xad   :  { %1951 = vmatmul.mubr.msk.f32.gmra.mrb[6].mxu1 %vm89_vm5, %v2439_v5  ;;  %1924 = vmatprep.mubr.msk.f32.mxu0 %vm2245_vm0, %v2246_v1 }
  0xae   :  { %1953 = vmatprep.mubr.msk.f32.mxu1 %vm2245_vm0, %v2246_v1 }
  0xb0   :  { %1925 = vmatmul.mubr.msk.f32.gmra.mrb[8].mxu0 %vm89_vm5, %v2442_v6 }
  0xb1   :  { %1954 = vmatmul.mubr.msk.f32.gmra.mrb[8].mxu1 %vm89_vm5, %v2442_v6  ;;  %1927 = vmatprep.mubr.msk.f32.mxu0 %vm2245_vm0, %v2246_v1 }
  0xb2   :  { %1956 = vmatprep.mubr.msk.f32.mxu1 %vm2245_vm0, %v2246_v1 }
  0xb4   :  { %1928 = vmatmul.mubr.msk.f32.gmra.mrb[10].mxu0 %vm89_vm5, %v2446_v7 }
  0xb5   :  { %1957 = vmatmul.mubr.msk.f32.gmra.mrb[10].mxu1 %vm89_vm5, %v2446_v7  ;;  %1930 = vmatprep.mubr.msk.f32.mxu0 %vm2245_vm0, %v2246_v1 }
  0xb6   :  { %1959 = vmatprep.mubr.msk.f32.mxu1 %vm2245_vm0, %v2246_v1 }
  0xb8   :  { %1931 = vmatmul.mubr.msk.f32.gmra.mrb[12].mxu0 %vm89_vm5, %v2420_v61 }
  0xb9   :  { %1960 = vmatmul.mubr.msk.f32.gmra.mrb[12].mxu1 %vm89_vm5, %v2420_v61  ;;  %1976 = vmatprep.mubr.msk.f32.mxu0 %vm2245_vm0, %v2246_v1 }
  0xba   :  { %1979 = vmatprep.mubr.msk.f32.mxu1 %vm2245_vm0, %v2246_v1 }
 0x173   :  { %v1153_v16 = vpop.f32.mrb[0].mxu0 }
 0x174   :  { %v1268_v45 = vpop.f32.mrb[0].mxu1  ;;  %v1914_v46 = vpop.f32.mrb[1].mxu0 }
 0x175   :  { %v1309_v50 = vmax.f32 %v1153_v16, %v1268_v45  ;;  %v1943_v51 = vpop.f32.mrb[1].mxu1 }
 0x177   :  { %v1158_v52 = vpop.f32.mrb[2].mxu0  ;;  %v1323_v4 = vrot.slane %v1309_v50, 1 }
 0x178   :  { %v1273_v53 = vpop.f32.mrb[2].mxu1  ;;  %v1917_v55 = vpop.f32.mrb[3].mxu0 }
 0x179   :  { %v1310_v2 = vmax.f32 %v1158_v52, %v1273_v53  ;;  %v1946_v3 = vpop.f32.mrb[3].mxu1 }
 0x17b   :  { %v1324_v5 = vrot.slane %v1310_v2, 1  ;;  %v1163_v6 = vpop.f32.mrb[4].mxu0 }
 0x17c   :  { %v1278_v61 = vpop.f32.mrb[4].mxu1  ;;  %v1920_v7 = vpop.f32.mrb[5].mxu0 }
 0x17d   :  { %v1325_v15 = vsel %vm75_vm4, %v1323_v4, %v1324_v5  ;;  %v1311_v17 = vmax.f32 %v1163_v6, %v1278_v61  ;;  %v1949_v18 = vpop.f32.mrb[5].mxu1 }
 0x17e   :  { %v1343_v20 = vmax.f32 %v1309_v50, %v1325_v15 }
 0x17f   :  { %v1326_v21 = vrot.slane %v1311_v17, 1  ;;  %v1168_v22 = vpop.f32.mrb[6].mxu0 }
 0x180   :  { %v1283_v23 = vpop.f32.mrb[6].mxu1  ;;  %v1923_v24 = vpop.f32.mrb[7].mxu0 }
 0x181   :  { %v1327_v25 = vsel %vm75_vm4, %v1324_v5, %v1326_v21  ;;  %v1312_v27 = vmax.f32 %v1168_v22, %v1283_v23  ;;  %v1952_v28 = vpop.f32.mrb[7].mxu1 }
 0x182   :  { %v1344_v29 = vmax.f32 %v1310_v2, %v1327_v25 }
 0x183   :  { %v1328_v30 = vrot.slane %v1312_v27, 1  ;;  %v1173_v31 = vpop.f32.mrb[8].mxu0 }
 0x184   :  { %v1288_v32 = vpop.f32.mrb[8].mxu1  ;;  %v1926_v33 = vpop.f32.mrb[9].mxu0  ;;  %v2056_v12 = vpack.c.bf16 %v1344_v29, %v1343_v20 }
 0x185   :  { %v1329_v14 = vsel %vm75_vm4, %v1326_v21, %v1328_v30  ;;  %v1313_v34 = vmax.f32 %v1173_v31, %v1288_v32  ;;  %v1955_v35 = vpop.f32.mrb[9].mxu1 }
 0x186   :  { %v1345_v36 = vmax.f32 %v1311_v17, %v1329_v14  ;;  %2057 = vmatpush3.bf16.msra.mxu0 %v2056_v12  ;;  %2068 = vmatpush3.bf16.msra.mxu1 %v2056_v12 }
 0x187   :  { %v1330_v38 = vrot.slane %v1313_v34, 1  ;;  %v1178_v39 = vpop.f32.mrb[10].mxu0  ;;  %2058 = vmatprep.subr.bf16.mxu0 %v2244_v0  ;;  %2065 = vmatprep.subr.bf16.mxu1 %v2244_v0 }
 0x188   :  { %v1293_v40 = vpop.f32.mrb[10].mxu1  ;;  %v1929_v42 = vpop.f32.mrb[11].mxu0 }
 0x189   :  { %v1331_v19 = vsel %vm75_vm4, %v1328_v30, %v1330_v38  ;;  %v1314_v43 = vmax.f32 %v1178_v39, %v1293_v40  ;;  %v1958_v47 = vpop.f32.mrb[11].mxu1 }
 0x18a   :  { %v1346_v26 = vmax.f32 %v1312_v27, %v1331_v19 }
 0x18b   :  { %v1332_v48 = vrot.slane %v1314_v43, 1  ;;  %v1183_v37 = vpop.f32.mrb[12].mxu0 }
 0x18c   :  { %v1298_v49 = vpop.f32.mrb[12].mxu1  ;;  %v1932_v54 = vpop.f32.mrb[13].mxu0  ;;  %v2059_v56 = vpack.c.bf16 %v1346_v26, %v1345_v36 }
 0x18d   :  { %v1333_v41 = vsel %vm75_vm4, %v1330_v38, %v1332_v48  ;;  %v1315_v44 = vmax.f32 %v1183_v37, %v1298_v49  ;;  %v1961_v57 = vpop.f32.mrb[13].mxu1 }
 0x18e   :  { %v1347_v58 = vmax.f32 %v1313_v34, %v1333_v41  ;;  %2060 = vmatpush3.bf16.msra.mxu0 %v2059_v56  ;;  %2069 = vmatpush3.bf16.msra.mxu1 %v2059_v56 }
 0x18f   :  { %v1334_v59 = vrot.slane %v1315_v44, 1  ;;  %2061 = vmatprep.subr.bf16.mxu0 %v2244_v0  ;;  %2066 = vmatprep.subr.bf16.mxu1 %v2244_v0  ;;  %v1350_v0 = vld [vmem:[%s2761_s4] sm:$0xff] }
 0x191   :  { %v1335_v60 = vsel %vm75_vm4, %v1332_v48, %v1334_v59  ;;  %v1349_v8 = vmax.f32 %v1315_v44, %v1334_v59 }
 0x192   :  { %v1348_v62 = vmax.f32 %v1314_v43, %v1335_v60 }
 0x194   :  { %v2062_v63 = vpack.c.bf16 %v1348_v62, %v1347_v58 }
 0x196   :  { %2063 = vmatpush3.bf16.msra.mxu0 %v2062_v63  ;;  %2070 = vmatpush3.bf16.msra.mxu1 %v2062_v63 }
 0x197   :  { %1974 = vmatprep.subr.mxu0 %v2246_v1  ;;  %2067 = vmatprep.subr.mxu1 %v2246_v1 }
 0x19a   :  { %1975 = vmatpush3.msk.msra.mxu0 %vm1370_vm8, %v1349_v8  ;;  %2071 = vmatpush3.msk.msra.mxu1 %vm1370_vm8, %v1349_v8 }
 0x19b   :  { %1980 = vmatmul.mubr.msk.f32.vlgmr.msra.gmra.mrb[14].mxu1 %vm1360_vm9, %v1351_v9  ;;  %1977 = vmatmul.mubr.msk.f32.vlgmr.msra.gmra.mrb[14].mxu0 %vm1360_vm9, %v1350_v0 }
 0x19c   :  { %1982 = vmatprep.mubr.msk.f32.mxu1 %vm2245_vm0, %v2246_v1 }
 0x19f   :  { %1983 = vmatmul.mubr.msk.f32.gmra.mrb[16].mxu1 %vm1360_vm9, %v1352_v10 }
 0x26e   :  { %v1445_v13 = vpop.f32.mrb[14].mxu1  ;;  %v1440_v16 = vpop.f32.mrb[14].mxu0 }
 0x26f   :  { %v1446_v45 = vadd.f32 %v1547_v11, %v1445_v13  ;;  %v1981_v46 = vpop.f32.mrb[15].mxu1  ;;  %v1441_v50 = vadd.f32 %v1547_v11, %v1440_v16  ;;  %v1978_v51 = vpop.f32.mrb[15].mxu0 }
 0x271   :  { %v1455_v52 = vmax.f32 %v1446_v45, 0.0  ;;  %v1454_v53 = vmax.f32 %v1441_v50, 0.0 }
 0x272   :  { %v1450_v55 = vpop.f32.mrb[16].mxu1 }
 0x273   :  { %1459 = vst.msk [vmem:[%s2762_s5 + $0x8] sm:$0xff] %vm1457_vm10, %v1455_v52  ;;  %1458 = vst.msk [vmem:[%s2762_s5] sm:$0xff] %vm1457_vm10, %v1454_v53  ;;  %v1451_v1 = vadd.f32 %v1547_v11, %v1450_v55  ;;  %v1984_v2 = vpop.f32.mrb[17].mxu1 }
 0x275   :  { %v1456_v3 = vmax.f32 %v1451_v1, 0.0 }
 0x277   :  { %1460 = vst.msk [vmem:[%s2762_s5 + $0x10] sm:$0xff] %vm1457_vm10, %v1456_v3 }
 0x278   :  { %1465 = vsyncpa [#allocation3], 1 }
 0x279   :  { %1466 = vsyncpa [#allocation5], 1 }

</bundles_post_ra>
